<compile_context>
chip_gen: v7x
topology: tpu7x:2x2x1
jax: 0.10.0
libtpu: 0.0.40
codegen_flags: <defaults>
</compile_context>

<pallas_src>
import functools

import jax
import jax.numpy as jnp
from jax.experimental import pallas as pl
from jax.experimental.pallas import tpu as pltpu


def _smooth_ce_kernel(pred_ref, tgt_ref, sum_ref, cnt_ref, *, eps, n_class,
                      n_rows):
    c = pl.program_id(0)   # split (TensorCore) index, "parallel"
    i = pl.program_id(1)   # row-tile step within this split, "arbitrary"

    # (Re)initialize this split's resident accumulator blocks at its first step.
    @pl.when(i == 0)
    def _():
        sum_ref[...] = jnp.zeros_like(sum_ref)
        cnt_ref[...] = jnp.zeros_like(cnt_ref)

    logits = pred_ref[...].astype(jnp.float32)          # (tile_n, C)
    tgt = tgt_ref[...]                                   # (tile_n, 1) int32
    tn = logits.shape[0]

    # log-softmax pieces without materializing log_prb or the smoothed one-hot.
    m = jnp.max(logits, axis=1, keepdims=True)           # (tn, 1)
    z = logits - m                                        # (tn, C)
    lse = jnp.log(jnp.sum(jnp.exp(z), axis=1, keepdims=True))   # (tn, 1)

    # z at the target class (single match per row) and sum over classes.
    col = jax.lax.broadcasted_iota(jnp.int32, (tn, n_class), 1)
    z_t = jnp.sum(jnp.where(col == tgt, z, 0.0), axis=1, keepdims=True)
    z_sum = jnp.sum(z, axis=1, keepdims=True)

    # NOTE: n_class is the *global* C (class axis is never tiled), so both the
    # smoothing denominator and the logsumexp are exact.
    off = eps / (n_class - 1)
    lp_t = z_t - lse                                      # log_prb[target]
    sum_lp = z_sum - n_class * lse                        # sum_c log_prb
    loss = -((1.0 - eps - off) * lp_t + off * sum_lp)     # (tn, 1)

    # Row-validity (cdiv padding / clamped last block) folded into finite mask.
    row0 = (c * pl.num_programs(1) + i) * tn
    row = jax.lax.broadcasted_iota(jnp.int32, (tn, 1), 0) + row0
    valid = (row < n_rows) & jnp.isfinite(loss)

    # Accumulate into the VMEM-resident (1,8,128) output blocks (broadcast the
    # scalar partial so every element of the block holds the running value).
    sum_ref[...] = sum_ref[...] + jnp.sum(jnp.where(valid, loss, 0.0))
    cnt_ref[...] = cnt_ref[...] + jnp.sum(valid.astype(jnp.float32))


def smooth_ce_loss(pred, target, smoothing_ratio=0.1, *, tile_n=None,
                   n_splits=2):
    """pred: (N, C) float, target: (N,) int -> scalar float32 loss."""
    N, C = pred.shape
    tgt2d = target.reshape(N, 1).astype(jnp.int32)

    # --- Tile-size selection: aim for ~8 MiB of logits per block (VMEM pads
    # the lane axis to 128), cap the row count, clamp to N, keep the sublane
    # rule (multiple of 8 or full extent) satisfied. ---
    lane_c = max(C, 128)
    if tile_n is None:
        tile_n = (8 << 20) // (lane_c * 4)
        tile_n = max(8, min(tile_n, 2048))
    if tile_n >= N:
        tile_n = N                          # full-extent block: always legal
    else:
        tile_n = max(8, (tile_n // 8) * 8)  # (8,128) sublane rule

    blocks = pl.cdiv(N, tile_n)
    n_splits = max(1, min(n_splits, blocks))     # 2-way split uses both v7x TCs
    steps = pl.cdiv(blocks, n_splits)

    def blk_idx(c, i):
        # Clamp so the DMA'd block never starts past the array; logically
        # out-of-range rows are masked inside the kernel via `row < N`.
        return jnp.minimum(c * steps + i, blocks - 1)

    kernel = functools.partial(
        _smooth_ce_kernel,
        eps=float(smoothing_ratio), n_class=C, n_rows=N)

    loss_sum, loss_cnt = pl.pallas_call(
        kernel,
        out_shape=(
            jax.ShapeDtypeStruct((n_splits, 8, 128), jnp.float32),
            jax.ShapeDtypeStruct((n_splits, 8, 128), jnp.float32),
        ),
        grid_spec=pltpu.PrefetchScalarGridSpec(
            num_scalar_prefetch=0,
            grid=(n_splits, steps),
            in_specs=[
                pl.BlockSpec((tile_n, C), lambda c, i: (blk_idx(c, i), 0)),
                pl.BlockSpec((tile_n, 1), lambda c, i: (blk_idx(c, i), 0)),
            ],
            out_specs=(
                pl.BlockSpec((1, 8, 128), lambda c, i: (c, 0, 0)),
                pl.BlockSpec((1, 8, 128), lambda c, i: (c, 0, 0)),
            ),
        ),
        compiler_params=pltpu.CompilerParams(
            dimension_semantics=("parallel", "arbitrary"),
            vmem_limit_bytes=48 << 20,
        ),
    )(pred, tgt2d)

    total_sum = jnp.sum(loss_sum[:, 0, 0])
    total_cnt = jnp.sum(loss_cnt[:, 0, 0])
    # NOTE: if every row is non-finite, cnt == 0 and this is NaN — matches the
    # reference semantics of loss[isfinite(loss)].mean().
    return (total_sum / total_cnt).astype(jnp.float32)


def smooth_ce_loss_ref(pred, target, smoothing_ratio=0.1):
    """Pure-JAX reference mirroring the PyTorch forward."""
    eps = smoothing_ratio
    n_class = pred.shape[1]
    one_hot = jax.nn.one_hot(target, n_class, dtype=pred.dtype)
    one_hot = one_hot * (1 - eps) + (1 - one_hot) * eps / (n_class - 1)
    log_prb = jax.nn.log_softmax(pred, axis=1)
    loss = -jnp.sum(one_hot * log_prb, axis=1)
    finite = jnp.isfinite(loss)
    return jnp.sum(jnp.where(finite, loss, 0.0)) / jnp.sum(finite)


if __name__ == "__main__":
    key = jax.random.PRNGKey(0)
    k1, k2 = jax.random.split(key)

    # Small point-cloud-style logits: 200 points, 13 classes (not tile-aligned,
    # to exercise the cdiv + row-mask path).
    N, C = 200, 13
    pred = jax.random.normal(k1, (N, C), dtype=jnp.float32)
    target = jax.random.randint(k2, (N,), 0, C, dtype=jnp.int32)

    ref = smooth_ce_loss_ref(pred, target, smoothing_ratio=0.1)

    # Default path: auto tile size (single full-extent block here).
    out = jax.block_until_ready(smooth_ce_loss(pred, target, 0.1))
    assert jnp.allclose(out, ref, rtol=1e-5, atol=1e-5), (out, ref)

    # Forced small tiles: exercises the multi-tile grid, 2-way parallel split,
    # block-index clamping and partial-last-block masking.
    out2 = jax.block_until_ready(smooth_ce_loss(pred, target, 0.1, tile_n=64))
    assert jnp.allclose(out2, ref, rtol=1e-5, atol=1e-5), (out2, ref)

    print("KERNEL_OK")
</pallas_src>

<mosaic_0001>
module attributes {stable_mosaic.version = 11 : i64} {
  func.func @_smooth_ce_kernel(%arg0: i32, %arg1: i32, %arg2: memref<200x13xf32, #tpu.memory_space<vmem>>, %arg3: memref<200x1xi32, #tpu.memory_space<vmem>>, %arg4: memref<1x8x128xf32, #tpu.memory_space<vmem>>, %arg5: memref<1x8x128xf32, #tpu.memory_space<vmem>>) attributes {dimension_semantics = [#tpu.dimension_semantics<parallel>, #tpu.dimension_semantics<arbitrary>], iteration_bounds = array<i64: 1, 1>, scalar_prefetch = 0 : i64, scratch_operands = 0 : i64, tpu.core_type = #tpu.core_type<tc>, window_params = [{transform_indices = @transform_0, window_bounds = array<i64: 200, 13>}, {transform_indices = @transform_1, window_bounds = array<i64: 200, 1>}, {transform_indices = @transform_2, window_bounds = array<i64: 1, 8, 128>}, {transform_indices = @transform_3, window_bounds = array<i64: 1, 8, 128>}]} {
    %c0_i32 = arith.constant 0 : i32
    %0 = arith.cmpi eq, %arg1, %c0_i32 : i32
    %1 = arith.extui %0 : i1 to i32
    %c0_i32_0 = arith.constant 0 : i32
    %2 = arith.cmpi ne, %1, %c0_i32_0 : i32
    scf.if %2 {
      %cst_29 = arith.constant 0.000000e+00 : f32
      %64 = vector.broadcast %cst_29 : f32 to vector<1x8x128xf32>
      %c0_30 = arith.constant 0 : index
      %c0_31 = arith.constant 0 : index
      %c0_32 = arith.constant 0 : index
      %65 = vector.load %arg4[%c0_30, %c0_31, %c0_32] : memref<1x8x128xf32, #tpu.memory_space<vmem>>, vector<1x8x128xf32>
      tpu.vector_store %arg4[%c0_30, %c0_31, %c0_32], %64 {strides = array<i32>} : memref<1x8x128xf32, #tpu.memory_space<vmem>>, vector<1x8x128xf32>,
      %cst_33 = arith.constant 0.000000e+00 : f32
      %66 = vector.broadcast %cst_33 : f32 to vector<1x8x128xf32>
      %c0_34 = arith.constant 0 : index
      %c0_35 = arith.constant 0 : index
      %c0_36 = arith.constant 0 : index
      %67 = vector.load %arg5[%c0_34, %c0_35, %c0_36] : memref<1x8x128xf32, #tpu.memory_space<vmem>>, vector<1x8x128xf32>
      tpu.vector_store %arg5[%c0_34, %c0_35, %c0_36], %66 {strides = array<i32>} : memref<1x8x128xf32, #tpu.memory_space<vmem>>, vector<1x8x128xf32>,
    } else {
    }
    %c0 = arith.constant 0 : index
    %c0_1 = arith.constant 0 : index
    %3 = vector.load %arg2[%c0, %c0_1] : memref<200x13xf32, #tpu.memory_space<vmem>>, vector<200x13xf32>
    %c0_2 = arith.constant 0 : index
    %c0_3 = arith.constant 0 : index
    %4 = vector.load %arg3[%c0_2, %c0_3] : memref<200x1xi32, #tpu.memory_space<vmem>>, vector<200x1xi32>
    %cst = arith.constant dense<0xFF800000> : vector<200xf32>
    %5 = vector.multi_reduction <maximumf>, %3, %cst [1] : vector<200x13xf32> to vector<200xf32>
    %6 = vector.shape_cast %5 : vector<200xf32> to vector<200x1xf32>
    %7 = vector.broadcast %6 : vector<200x1xf32> to vector<200x13xf32>
    %8 = arith.subf %3, %7 : vector<200x13xf32>
    %9 = math.exp %8 : vector<200x13xf32>
    %cst_4 = arith.constant dense<0.000000e+00> : vector<200xf32>
    %10 = vector.multi_reduction <add>, %9, %cst_4 [1] : vector<200x13xf32> to vector<200xf32>
    %11 = vector.shape_cast %10 : vector<200xf32> to vector<200x1xf32>
    %12 = math.log %11 : vector<200x1xf32>
    %13 = tpu.iota {dimensions = array<i32: 1>} : vector<200x13xi32>
    %14 = vector.broadcast %4 : vector<200x1xi32> to vector<200x13xi32>
    %15 = arith.cmpi eq, %13, %14 : vector<200x13xi32>
    %cst_5 = arith.constant 0.000000e+00 : f32
    %16 = vector.broadcast %cst_5 : f32 to vector<200x13xf32>
    %17 = arith.select %15, %8, %16 : vector<200x13xi1>, vector<200x13xf32>
    %cst_6 = arith.constant dense<0.000000e+00> : vector<200xf32>
    %18 = vector.multi_reduction <add>, %17, %cst_6 [1] : vector<200x13xf32> to vector<200xf32>
    %19 = vector.shape_cast %18 : vector<200xf32> to vector<200x1xf32>
    %cst_7 = arith.constant dense<0.000000e+00> : vector<200xf32>
    %20 = vector.multi_reduction <add>, %8, %cst_7 [1] : vector<200x13xf32> to vector<200xf32>
    %21 = vector.shape_cast %20 : vector<200xf32> to vector<200x1xf32>
    %22 = arith.subf %19, %12 : vector<200x1xf32>
    %cst_8 = arith.constant 1.300000e+01 : f32
    %23 = vector.broadcast %cst_8 : f32 to vector<200x1xf32>
    %24 = arith.mulf %23, %12 : vector<200x1xf32>
    %25 = arith.subf %21, %24 : vector<200x1xf32>
    %cst_9 = arith.constant 0.891666651 : f32
    %26 = vector.broadcast %cst_9 : f32 to vector<200x1xf32>
    %27 = arith.mulf %26, %22 : vector<200x1xf32>
    %cst_10 = arith.constant 0.00833333377 : f32
    %28 = vector.broadcast %cst_10 : f32 to vector<200x1xf32>
    %29 = arith.mulf %28, %25 : vector<200x1xf32>
    %30 = arith.addf %27, %29 : vector<200x1xf32>
    %cst_11 = arith.constant 0.000000e+00 : f32
    %31 = vector.broadcast %cst_11 : f32 to vector<200x1xf32>
    %32 = arith.subf %31, %30 : vector<200x1xf32>
    %c1_i32 = arith.constant 1 : i32
    %33 = arith.muli %arg0, %c1_i32 : i32
    %34 = arith.addi %33, %arg1 : i32
    %c200_i32 = arith.constant 200 : i32
    %35 = arith.muli %34, %c200_i32 : i32
    %36 = tpu.iota {dimensions = array<i32: 0>} : vector<200x1xi32>
    %37 = vector.broadcast %35 : i32 to vector<200x1xi32>
    %38 = arith.addi %36, %37 : vector<200x1xi32>
    %c200_i32_12 = arith.constant 200 : i32
    %39 = vector.broadcast %c200_i32_12 : i32 to vector<200x1xi32>
    %40 = arith.cmpi slt, %38, %39 : vector<200x1xi32>
    %41 = tpu.weird %32 : vector<200x1xf32> -> vector<200x1xi1>
    %cst_13 = arith.constant dense<true> : vector<200x1xi1>
    %42 = arith.xori %41, %cst_13 : vector<200x1xi1>
    %43 = arith.andi %40, %42 : vector<200x1xi1>
    %c0_14 = arith.constant 0 : index
    %c0_15 = arith.constant 0 : index
    %c0_16 = arith.constant 0 : index
    %44 = vector.load %arg4[%c0_14, %c0_15, %c0_16] : memref<1x8x128xf32, #tpu.memory_space<vmem>>, vector<1x8x128xf32>
    %cst_17 = arith.constant 0.000000e+00 : f32
    %45 = vector.broadcast %cst_17 : f32 to vector<200x1xf32>
    %46 = arith.select %43, %32, %45 : vector<200x1xi1>, vector<200x1xf32>
    %47 = vector.shape_cast %46 : vector<200x1xf32> to vector<1x200x1xf32>
    %cst_18 = arith.constant dense<0.000000e+00> : vector<1xf32>
    %48 = vector.multi_reduction <add>, %47, %cst_18 [1, 2] : vector<1x200x1xf32> to vector<1xf32>
    %49 = vector.shape_cast %48 : vector<1xf32> to vector<1x1x1xf32>
    %50 = vector.extract %49[0, 0, 0] : f32 from vector<1x1x1xf32>
    %51 = vector.broadcast %50 : f32 to vector<1x8x128xf32>
    %52 = arith.addf %44, %51 : vector<1x8x128xf32>
    %c0_19 = arith.constant 0 : index
    %c0_20 = arith.constant 0 : index
    %c0_21 = arith.constant 0 : index
    %53 = vector.load %arg4[%c0_19, %c0_20, %c0_21] : memref<1x8x128xf32, #tpu.memory_space<vmem>>, vector<1x8x128xf32>
    tpu.vector_store %arg4[%c0_19, %c0_20, %c0_21], %52 {strides = array<i32>} : memref<1x8x128xf32, #tpu.memory_space<vmem>>, vector<1x8x128xf32>,
    %c0_22 = arith.constant 0 : index
    %c0_23 = arith.constant 0 : index
    %c0_24 = arith.constant 0 : index
    %54 = vector.load %arg5[%c0_22, %c0_23, %c0_24] : memref<1x8x128xf32, #tpu.memory_space<vmem>>, vector<1x8x128xf32>
    %55 = arith.extui %43 : vector<200x1xi1> to vector<200x1xi32>
    %56 = arith.sitofp %55 : vector<200x1xi32> to vector<200x1xf32>
    %57 = vector.shape_cast %56 : vector<200x1xf32> to vector<1x200x1xf32>
    %cst_25 = arith.constant dense<0.000000e+00> : vector<1xf32>
    %58 = vector.multi_reduction <add>, %57, %cst_25 [1, 2] : vector<1x200x1xf32> to vector<1xf32>
    %59 = vector.shape_cast %58 : vector<1xf32> to vector<1x1x1xf32>
    %60 = vector.extract %59[0, 0, 0] : f32 from vector<1x1x1xf32>
    %61 = vector.broadcast %60 : f32 to vector<1x8x128xf32>
    %62 = arith.addf %54, %61 : vector<1x8x128xf32>
    %c0_26 = arith.constant 0 : index
    %c0_27 = arith.constant 0 : index
    %c0_28 = arith.constant 0 : index
    %63 = vector.load %arg5[%c0_26, %c0_27, %c0_28] : memref<1x8x128xf32, #tpu.memory_space<vmem>>, vector<1x8x128xf32>
    tpu.vector_store %arg5[%c0_26, %c0_27, %c0_28], %62 {strides = array<i32>} : memref<1x8x128xf32, #tpu.memory_space<vmem>>, vector<1x8x128xf32>,
    return
  }
  func.func @transform_0(%arg0: i32, %arg1: i32) -> (i32, i32) {
    %c1_i32 = arith.constant 1 : i32
    %0 = arith.muli %arg0, %c1_i32 : i32
    %1 = arith.addi %0, %arg1 : i32
    %c0_i32 = arith.constant 0 : i32
    %2 = arith.minsi %1, %c0_i32 : i32
    %c0_i32_0 = arith.constant 0 : i32
    %c0_i32_1 = arith.constant 0 : i32
    return %2, %c0_i32_0 : i32, i32
  }
  func.func @transform_1(%arg0: i32, %arg1: i32) -> (i32, i32) {
    %c1_i32 = arith.constant 1 : i32
    %0 = arith.muli %arg0, %c1_i32 : i32
    %1 = arith.addi %0, %arg1 : i32
    %c0_i32 = arith.constant 0 : i32
    %2 = arith.minsi %1, %c0_i32 : i32
    %c0_i32_0 = arith.constant 0 : i32
    %c0_i32_1 = arith.constant 0 : i32
    return %2, %c0_i32_0 : i32, i32
  }
  func.func @transform_2(%arg0: i32, %arg1: i32) -> (i32, i32, i32) {
    %c0_i32 = arith.constant 0 : i32
    %c0_i32_0 = arith.constant 0 : i32
    %c0_i32_1 = arith.constant 0 : i32
    return %arg0, %c0_i32, %c0_i32_0 : i32, i32, i32
  }
  func.func @transform_3(%arg0: i32, %arg1: i32) -> (i32, i32, i32) {
    %c0_i32 = arith.constant 0 : i32
    %c0_i32_0 = arith.constant 0 : i32
    %c0_i32_1 = arith.constant 0 : i32
    return %arg0, %c0_i32, %c0_i32_0 : i32, i32, i32
  }
}

</mosaic_0001>

<bundles_post_ra>
// kernel: tpu_custom_call.1
= control target key start
LH: loop header
LB: loop body
LE: loop exit
PB: predicated region body
PF: predicated region fallthrough
CT: control target
= control target key end

     0   :  { %9 = vsyncpa [#allocation3], 0  ;;  %vm135_vm0 = vcmask 105472   ;;  %v1441_v6 = vmov 0   ;;  %s2278_s0 = inlined_call_operand.vmem [shape: f32[200,13], index: 0, kind: input, shape index: {}]   ;;  %s2279_s1 = inlined_call_operand.vmem [shape: s32[200,1], index: 1, kind: input, shape index: {}]   ;;  %s2280_s2 = inlined_call_operand.hbm [shape: f32[1,8,128], index: 2, kind: output, shape index: {0}]   ;;  %s2281_s3 = inlined_call_operand.hbm [shape: f32[1,8,128], index: 3, kind: output, shape index: {1}]  }
   0x1   :  { %v1469_v0 = vld [vmem:[%s2278_s0 + $0x10] sm:$0xff]  ;;  %v1474_v1 = vld [vmem:[%s2278_s0] sm:$0xff]  ;;  %v1479_v2 = vld [vmem:[%s2278_s0 + $0x18] sm:$0xff]  ;;  %1291 = vset.pattern.permute.xlu1 %v1441_v6  ;;  %1292 = vset.pattern.permute.xlu0 %v1441_v6 }
   0x2   :  { %v142_v3 = vsel %vm135_vm0, %v1469_v0, -inf  ;;  %v136_v4 = vsel %vm135_vm0, %v1474_v1, -inf  ;;  %v1488_v5 = vld [vmem:[%s2278_s0 + $0x8] sm:$0xff]  ;;  %v145_v7 = vsel %vm135_vm0, %v1479_v2, -inf  ;;  %v1502_v10 = vld [vmem:[%s2278_s0 + $0x20] sm:$0xff]  ;;  %v1511_v13 = vld [vmem:[%s2278_s0 + $0x38] sm:$0xff] }
   0x3   :  { %143 = vmax.xlane.f32.xlu1 %v142_v3  ;;  %137 = vmax.xlane.f32.xlu0 %v136_v4  ;;  %v139_v8 = vsel %vm135_vm0, %v1488_v5, -inf  ;;  %v1497_v9 = vld [vmem:[%s2278_s0 + $0x28] sm:$0xff]  ;;  %v148_v12 = vsel %vm135_vm0, %v1502_v10, -inf  ;;  %v1516_v14 = vld [vmem:[%s2278_s0 + $0x30] sm:$0xff]  ;;  %v157_v15 = vsel %vm135_vm0, %v1511_v13, -inf  ;;  %v1530_v18 = vld [vmem:[%s2278_s0 + $0x40] sm:$0xff] }
   0x4   :  { %v151_v11 = vsel %vm135_vm0, %v1497_v9, -inf  ;;  %v154_v16 = vsel %vm135_vm0, %v1516_v14, -inf  ;;  %v1525_v17 = vld [vmem:[%s2278_s0 + $0x48] sm:$0xff]  ;;  %v160_v20 = vsel %vm135_vm0, %v1530_v18, -inf  ;;  %v1539_v21 = vld [vmem:[%s2278_s0 + $0x58] sm:$0xff]  ;;  %v1544_v22 = vld [vmem:[%s2278_s0 + $0x50] sm:$0xff] }
   0x5   :  { %v163_v19 = vsel %vm135_vm0, %v1525_v17, -inf }
   0x7   :  { %146 = vmax.xlane.f32.xlu1 %v145_v7  ;;  %140 = vmax.xlane.f32.xlu0 %v139_v8 }
   0xb   :  { %152 = vmax.xlane.f32.xlu1 %v151_v11  ;;  %149 = vmax.xlane.f32.xlu0 %v148_v12 }
   0xf   :  { %158 = vmax.xlane.f32.xlu1 %v157_v15  ;;  %155 = vmax.xlane.f32.xlu0 %v154_v16 }
  0x10   :  { %10 = vsyncpa [#allocation5], 0  ;;  %v169_v23 = vsel %vm135_vm0, %v1539_v21, -inf  ;;  %v166_v24 = vsel %vm135_vm0, %v1544_v22, -inf  ;;  %v1553_v25 = vld [vmem:[%s2278_s0 + $0x68] sm:$0xff]  ;;  %v1558_v26 = vld [vmem:[%s2278_s0 + $0x60] sm:$0xff] }
  0x11   :  { %v175_v27 = vsel %vm135_vm0, %v1553_v25, -inf  ;;  %v172_v28 = vsel %vm135_vm0, %v1558_v26, -inf  ;;  %v1567_v29 = vld [vmem:[%s2278_s0 + $0x78] sm:$0xff]  ;;  %v1572_v30 = vld [vmem:[%s2278_s0 + $0x70] sm:$0xff]  ;;  %v1581_v33 = vld [vmem:[%s2278_s0 + $0x88] sm:$0xff]  ;;  %s1445_s4 = smov [#allocation4]  }
  0x12   :  { %v181_v31 = vsel %vm135_vm0, %v1567_v29, -inf  ;;  %v178_v32 = vsel %vm135_vm0, %v1572_v30, -inf  ;;  %v1586_v34 = vld [vmem:[%s2278_s0 + $0x80] sm:$0xff]  ;;  %v187_v35 = vsel %vm135_vm0, %v1581_v33, -inf  ;;  %v1595_v37 = vld [vmem:[%s2278_s0 + $0x98] sm:$0xff]  ;;  %v1600_v38 = vld [vmem:[%s2278_s0 + $0x90] sm:$0xff] }
  0x13   :  { %164 = vmax.xlane.f32.xlu1 %v163_v19  ;;  %161 = vmax.xlane.f32.xlu0 %v160_v20  ;;  %v184_v36 = vsel %vm135_vm0, %v1586_v34, -inf  ;;  %v193_v39 = vsel %vm135_vm0, %v1595_v37, -inf  ;;  %v190_v40 = vsel %vm135_vm0, %v1600_v38, -inf  ;;  %v1609_v41 = vld [vmem:[%s2278_s0 + $0xa8] sm:$0xff]  ;;  %v1614_v42 = vld [vmem:[%s2278_s0 + $0xa0] sm:$0xff]  ;;  %v1623_v45 = vld [vmem:[%s2278_s0 + $0xb8] sm:$0xff] }
  0x14   :  { %v199_v43 = vsel %vm135_vm0, %v1609_v41, -inf  ;;  %v196_v44 = vsel %vm135_vm0, %v1614_v42, -inf  ;;  %v1628_v46 = vld [vmem:[%s2278_s0 + $0xb0] sm:$0xff]  ;;  %v205_v47 = vsel %vm135_vm0, %v1623_v45, -inf  ;;  %v1637_v49 = vld [vmem:[%s2278_s0 + $0xc0] sm:$0xff]  ;;  %v113_v52 = vld [vmem:[%s2279_s1 + $0x18] sm:$0xff] }
  0x15   :  { %v202_v48 = vsel %vm135_vm0, %v1628_v46, -inf  ;;  %v208_v50 = vsel %vm135_vm0, %v1637_v49, -inf  ;;  %v110_v51 = vld [vmem:[%s2279_s1] sm:$0xff]  ;;  %v115_v53 = vld [vmem:[%s2279_s1 + $0x28] sm:$0xff]  ;;  %v117_v55 = vld [vmem:[%s2279_s1 + $0x38] sm:$0xff]  ;;  %s1233_s5 = sshll.u32 %s1445_s4, 4  ;;  %s1234_s5 = int_to_ptr.vmem [resolvable:$true] %s1233_s5 }
  0x16   :  { %v111_v54 = vld [vmem:[%s2279_s1 + $0x8] sm:$0xff]  ;;  %v112_v56 = vld [vmem:[%s2279_s1 + $0x10] sm:$0xff]  ;;  %v118_v57 = vld [vmem:[%s2279_s1 + $0x40] sm:$0xff] }
  0x17   :  { %170 = vmax.xlane.f32.xlu1 %v169_v23  ;;  %167 = vmax.xlane.f32.xlu0 %v166_v24  ;;  %v114_v58 = vld [vmem:[%s2279_s1 + $0x20] sm:$0xff]  ;;  %v119_v59 = vld [vmem:[%s2279_s1 + $0x48] sm:$0xff]  ;;  %v116_v60 = vld [vmem:[%s2279_s1 + $0x30] sm:$0xff] }
  0x18   :  { %v120_v61 = vld [vmem:[%s2279_s1 + $0x50] sm:$0xff]  ;;  %v122_v62 = vld [vmem:[%s2279_s1 + $0x60] sm:$0xff]  ;;  %v121_v63 = vld [vmem:[%s2279_s1 + $0x58] sm:$0xff] }
  0x19   :  { %v128_v3 = vld [vmem:[%s2279_s1 + $0x90] sm:$0xff]  ;;  %v123_v4 = vld [vmem:[%s2279_s1 + $0x68] sm:$0xff]  ;;  %v130_v6 = vld [vmem:[%s2279_s1 + $0xa0] sm:$0xff] }
  0x1a   :  { %v124_v7 = vld [vmem:[%s2279_s1 + $0x70] sm:$0xff]  ;;  %v125_v11 = vld [vmem:[%s2279_s1 + $0x78] sm:$0xff]  ;;  %v134_v12 = vld [vmem:[%s2279_s1 + $0xc0] sm:$0xff] }
  0x1b   :  { %176 = vmax.xlane.f32.xlu1 %v175_v27  ;;  %173 = vmax.xlane.f32.xlu0 %v172_v28  ;;  %v132_v8 = vld [vmem:[%s2279_s1 + $0xb0] sm:$0xff]  ;;  %v126_v15 = vld [vmem:[%s2279_s1 + $0x80] sm:$0xff]  ;;  %v127_v16 = vld [vmem:[%s2279_s1 + $0x88] sm:$0xff] }
  0x1c   :  { %v129_v19 = vld [vmem:[%s2279_s1 + $0x98] sm:$0xff]  ;;  %v131_v20 = vld [vmem:[%s2279_s1 + $0xa8] sm:$0xff] }
  0x1d   :  { %v133_v23 = vld [vmem:[%s2279_s1 + $0xb8] sm:$0xff]  ;;  %s1444_s1 = smov [#allocation2]  }
  0x1e   :  { %s1223_s29 = sshll.u32 %s1444_s1, 4  ;;  %s1224_s29 = int_to_ptr.vmem [resolvable:$true] %s1223_s29 }
  0x1f   :  { %182 = vmax.xlane.f32.xlu1 %v181_v31  ;;  %179 = vmax.xlane.f32.xlu0 %v178_v32  ;;  %s1393_s7 = scalar_lea.vmem %s1224_s29, 128  ;;  %p1398_p1 = scmp.lt.s32.totalorder %s1224_s29, %s1224_s29 }
  0x20   :  { %p1394_p0 = scmp.ne.s32.totalorder %s1224_s29, %s1393_s7  ;;  %p1399_p2 = scmp.lt.s32.totalorder %s1393_s7, %s1393_s7 }
  0x22   :  { %p1400_p3 = por %p1399_p2, %p1398_p1 }
  0x23   :  { %188 = vmax.xlane.f32.xlu1 %v187_v35  ;;  %185 = vmax.xlane.f32.xlu0 %v184_v36 }
  0x24   :  { %p1401_p4 = pnand %p1400_p3, %p1394_p0 }
  0x27   :  { %194 = vmax.xlane.f32.xlu1 %v193_v39  ;;  %191 = vmax.xlane.f32.xlu0 %v190_v40 }
  0x2b   :  { %200 = vmax.xlane.f32.xlu1 %v199_v43  ;;  %197 = vmax.xlane.f32.xlu0 %v196_v44 }
  0x2f   :  { %206 = vmax.xlane.f32.xlu1 %v205_v47  ;;  %203 = vmax.xlane.f32.xlu0 %v202_v48 }
  0x33   :  { %209 = vmax.xlane.f32.xlu0 %v208_v50 }
  0x40   :  { %414 = vperm.xlu1 %1291, %v110_v51  }
  0x44   :  { %423 = vperm.xlu1 %1291, %v113_v52  }
  0x48   :  { %429 = vperm.xlu1 %1291, %v115_v53  }
  0x49   :  { %417 = vperm.xlu0 %1292, %v111_v54  }
  0x4c   :  { %435 = vperm.xlu1 %1291, %v117_v55  }
  0x4d   :  { %420 = vperm.xlu0 %1292, %v112_v56  }
  0x50   :  { %438 = vperm.xlu1 %1291, %v118_v57  }
  0x51   :  { %426 = vperm.xlu0 %1292, %v114_v58  }
  0x54   :  { %441 = vperm.xlu1 %1291, %v119_v59  }
  0x55   :  { %432 = vperm.xlu0 %1292, %v116_v60  }
  0x58   :  { %444 = vperm.xlu1 %1291, %v120_v61  }
  0x59   :  { %450 = vperm.xlu0 %1292, %v122_v62  }
  0x5c   :  { %447 = vperm.xlu1 %1291, %v121_v63  }
  0x5d   :  { %468 = vperm.xlu0 %1292, %v128_v3  }
  0x60   :  { %453 = vperm.xlu1 %1291, %v123_v4  }
  0x61   :  { %474 = vperm.xlu0 %1292, %v130_v6  }
  0x64   :  { %456 = vperm.xlu1 %1291, %v124_v7  }
  0x65   :  { %480 = vperm.xlu0 %1292, %v132_v8  }
  0x68   :  { %459 = vperm.xlu1 %1291, %v125_v11  }
  0x69   :  { %486 = vperm.xlu0 %1292, %v134_v12  }
  0x6c   :  { %462 = vperm.xlu1 %1291, %v126_v15  }
  0x70   :  { %465 = vperm.xlu1 %1291, %v127_v16  }
  0x74   :  { %471 = vperm.xlu1 %1291, %v129_v19  }
  0x78   :  { %477 = vperm.xlu1 %1291, %v131_v20  }
  0x7c   :  { %483 = vperm.xlu1 %1291, %v133_v23  }
  0x90   :  { %v144_v24 = vpop.xlane.xlu1 %143  ;;  %v138_v27 = vpop.xlane.xlu0 %137 }
  0x91   :  { %v1717_v28 = vsub.f32 %v1469_v0, %v144_v24  ;;  %v1720_v31 = vsub.f32 %v1474_v1, %v138_v27 }
  0x93   :  { %v236_v32 = vmul.f32 1.442695, %v1720_v31  ;;  %v240_v35 = vmul.f32 1.442695, %v1717_v28 }
  0x94   :  { %v147_v36 = vpop.xlane.xlu1 %146  ;;  %v141_v39 = vpop.xlane.xlu0 %140 }
  0x95   :  { %v1725_v40 = vsub.f32 %v1479_v2, %v147_v36  ;;  %v1728_v43 = vsub.f32 %v1488_v5, %v141_v39  ;;  %1293 = vpow2.f32 %v236_v32 }
  0x96   :  { %1295 = vpow2.f32 %v240_v35 }
  0x97   :  { %v242_v44 = vmul.f32 1.442695, %v1725_v40  ;;  %v238_v0 = vmul.f32 1.442695, %v1728_v43 }
  0x98   :  { %v153_v1 = vpop.xlane.xlu1 %152  ;;  %v150_v47 = vpop.xlane.xlu0 %149 }
  0x99   :  { %1297 = vpow2.f32 %v242_v44  ;;  %v1733_v48 = vsub.f32 %v1497_v9, %v153_v1  ;;  %v1736_v50 = vsub.f32 %v1502_v10, %v150_v47 }
  0x9a   :  { %1299 = vpow2.f32 %v238_v0 }
  0x9b   :  { %v246_v2 = vmul.f32 1.442695, %v1733_v48  ;;  %v244_v5 = vmul.f32 1.442695, %v1736_v50 }
  0x9c   :  { %v159_v51 = vpop.xlane.xlu1 %158  ;;  %v156_v52 = vpop.xlane.xlu0 %155 }
  0x9d   :  { %1301 = vpow2.f32 %v246_v2  ;;  %v1741_v53 = vsub.f32 %v1511_v13, %v159_v51  ;;  %v1744_v54 = vsub.f32 %v1516_v14, %v156_v52 }
  0x9e   :  { %1303 = vpow2.f32 %v244_v5  ;;  %v411_v5 = vlaneseq }
  0x9f   :  { %v250_v9 = vmul.f32 1.442695, %v1741_v53  ;;  %v1294_v55 = vpop.eup %1293  ;;  %v248_v10 = vmul.f32 1.442695, %v1744_v54 }
  0xa0   :  { %v165_v56 = vpop.xlane.xlu1 %164  ;;  %v162_v57 = vpop.xlane.xlu0 %161  ;;  %v286_v59 = vsel %vm135_vm0, %v1294_v55, 0.0 }
  0xa1   :  { %1305 = vpow2.f32 %v250_v9  ;;  %v1749_v58 = vsub.f32 %v1530_v18, %v162_v57  ;;  %v1296_v60 = vpop.eup %1295  ;;  %287 = vadd.xlane.f32.xlu1 %v286_v59  ;;  %v1774_v1 = vsub.f32 %v1525_v17, %v165_v56  ;;  %v1783_v9 = vand.u32 127, %v411_v5 }
  0xa2   :  { %1307 = vpow2.f32 %v248_v10  ;;  %v292_v18 = vsel %vm135_vm0, %v1296_v60, 0.0 }
  0xa3   :  { %v1298_v13 = vpop.eup %1297  ;;  %v252_v14 = vmul.f32 1.442695, %v1749_v58  ;;  %v254_v51 = vmul.f32 1.442695, %v1774_v1 }
  0xa4   :  { %v1300_v61 = vpop.eup %1299  ;;  %v171_v62 = vpop.xlane.xlu1 %170  ;;  %v295_v3 = vsel %vm135_vm0, %v1298_v13, 0.0 }
  0xa5   :  { %v168_v63 = vpop.xlane.xlu0 %167  ;;  %v289_v4 = vsel %vm135_vm0, %v1300_v61, 0.0  ;;  %296 = vadd.xlane.f32.xlu1 %v295_v3  ;;  %1309 = vpow2.f32 %v252_v14  ;;  %v1788_v57 = vsub.f32 %v1539_v21, %v171_v62  ;;  %v613_v21 = vsel %vm135_vm0, %v1720_v31, 0.0 }
  0xa6   :  { %290 = vadd.xlane.f32.xlu0 %v289_v4  ;;  %1311 = vpow2.f32 %v254_v51  ;;  %v1792_v17 = vsub.f32 %v1544_v22, %v168_v63 }
  0xa7   :  { %v1302_v6 = vpop.eup %1301  ;;  %v258_v13 = vmul.f32 1.442695, %v1788_v57 }
  0xa8   :  { %v177_v7 = vpop.xlane.xlu1 %176  ;;  %v301_v11 = vsel %vm135_vm0, %v1302_v6, 0.0  ;;  %v1304_v12 = vpop.eup %1303  ;;  %v256_v61 = vmul.f32 1.442695, %v1792_v17 }
  0xa9   :  { %v174_v8 = vpop.xlane.xlu0 %173  ;;  %302 = vadd.xlane.f32.xlu1 %v301_v11  ;;  %v298_v23 = vsel %vm135_vm0, %v1304_v12, 0.0  ;;  %1313 = vpow2.f32 %v258_v13  ;;  %v619_v11 = vsel %vm135_vm0, %v1717_v28, 0.0  ;;  %v616_v12 = vsel %vm135_vm0, %v1728_v43, 0.0 }
  0xaa   :  { %293 = vadd.xlane.f32.xlu0 %v292_v18  ;;  %1315 = vpow2.f32 %v256_v61  ;;  %v1807_v18 = vsub.f32 %v1553_v25, %v177_v7 }
  0xab   :  { %v1306_v15 = vpop.eup %1305 }
  0xac   :  { %v1757_v16 = vpop.xlane.xlu1 %182  ;;  %v307_v20 = vsel %vm135_vm0, %v1306_v15, 0.0  ;;  %v1308_v24 = vpop.eup %1307  ;;  %v262_v7 = vmul.f32 1.442695, %v1807_v18 }
  0xad   :  { %v1759_v19 = vpop.xlane.xlu0 %179  ;;  %308 = vadd.xlane.f32.xlu1 %v307_v20  ;;  %v304_v35 = vsel %vm135_vm0, %v1308_v24, 0.0  ;;  %v1830_v51 = vsub.f32 %v1567_v29, %v1757_v16 }
  0xae   :  { %299 = vadd.xlane.f32.xlu0 %v298_v23  ;;  %1317 = vpow2.f32 %v262_v7 }
  0xaf   :  { %v1310_v36 = vpop.eup %1309  ;;  %v266_v61 = vmul.f32 1.442695, %v1830_v51 }
  0xb0   :  { %v1763_v27 = vpop.xlane.xlu1 %188  ;;  %v310_v0 = vsel %vm135_vm0, %v1310_v36, 0.0  ;;  %v1312_v14 = vpop.eup %1311 }
  0xb1   :  { %v1765_v32 = vpop.xlane.xlu0 %185  ;;  %v313_v3 = vsel %vm135_vm0, %v1312_v14, 0.0 }
  0xb2   :  { %305 = vadd.xlane.f32.xlu0 %v304_v35 }
  0xb3   :  { %v1314_v24 = vpop.eup %1313 }
  0xb4   :  { %v1768_v39 = vpop.xlane.xlu1 %194  ;;  %v1316_v35 = vpop.eup %1315 }
  0xb5   :  { %v1770_v44 = vpop.xlane.xlu0 %191 }
  0xb6   :  { %311 = vadd.xlane.f32.xlu0 %v310_v0  ;;  %v319_v0 = vsel %vm135_vm0, %v1314_v24, 0.0 }
  0xb8   :  { %v1776_v47 = vpop.xlane.xlu1 %200 }
  0xb9   :  { %v1778_v2 = vpop.xlane.xlu0 %197 }
  0xbc   :  { %v1781_v52 = vpop.xlane.xlu1 %206 }
  0xbd   :  { %v1785_v55 = vpop.xlane.xlu0 %203 }
  0xc0   :  { %v415_v10 = vpop.permute.xlu1 %414 }
  0xc1   :  { %vm488_vm1 = vcmp.eq.s32.totalorder %v1783_v9, %v415_v10  ;;  %v1796_v60 = vpop.xlane.xlu0 %209  ;;  %v1836_v10 = vsub.f32 %v1572_v30, %v1759_v19  ;;  %v1318_v30 = vpop.eup %1317 }
  0xc2   :  { %v513_v56 = vsel %vm488_vm1, %v1720_v31, 0.0  ;;  %v1812_v31 = vsub.f32 %v1558_v26, %v174_v8 }
  0xc3   :  { %v538_v59 = vsel %vm135_vm0, %v513_v56, 0.0  ;;  %v625_v56 = vsel %vm135_vm0, %v1736_v50, 0.0 }
  0xc4   :  { %539 = vadd.xlane.f32.xlu1 %v538_v59  ;;  %v424_v22 = vpop.permute.xlu1 %423  ;;  %v260_v23 = vmul.f32 1.442695, %v1812_v31  ;;  %v622_v59 = vsel %vm135_vm0, %v1725_v40, 0.0 }
  0xc5   :  { %vm491_vm3 = vcmp.eq.s32.totalorder %v1783_v9, %v424_v22 }
  0xc6   :  { %v516_v20 = vsel %vm491_vm3, %v1725_v40, 0.0  ;;  %1319 = vpow2.f32 %v260_v23 }
  0xc7   :  { %v547_v26 = vsel %vm135_vm0, %v516_v20, 0.0  ;;  %1321 = vpow2.f32 %v266_v61 }
  0xc8   :  { %614 = vadd.xlane.f32.xlu1 %v613_v21  ;;  %v418_v62 = vpop.permute.xlu0 %417  ;;  %v430_v36 = vpop.permute.xlu1 %429  ;;  %v264_v21 = vmul.f32 1.442695, %v1836_v10 }
  0xc9   :  { %vm489_vm2 = vcmp.eq.s32.totalorder %v1783_v9, %v418_v62  ;;  %vm493_vm5 = vcmp.eq.s32.totalorder %v1783_v9, %v430_v36  ;;  %v634_v36 = vsel %vm135_vm0, %v1741_v53, 0.0 }
  0xca   :  { %v514_v63 = vsel %vm489_vm2, %v1728_v43, 0.0  ;;  %v518_v29 = vsel %vm493_vm5, %v1733_v48, 0.0  ;;  %1323 = vpow2.f32 %v264_v21  ;;  %v1916_v21 = vsub.f32 %v1614_v42, %v1778_v2 }
  0xcb   :  { %v541_v4 = vsel %vm135_vm0, %v514_v63, 0.0  ;;  %v553_v19 = vsel %vm135_vm0, %v518_v29, 0.0  ;;  %v325_v63 = vsel %vm135_vm0, %v1318_v30, 0.0  ;;  %v643_v30 = vsel %vm135_vm0, %v1792_v17, 0.0 }
  0xcc   :  { %314 = vadd.xlane.f32.xlu1 %v313_v3  ;;  %542 = vadd.xlane.f32.xlu0 %v541_v4  ;;  %v421_v6 = vpop.permute.xlu0 %420  ;;  %v436_v22 = vpop.permute.xlu1 %435  ;;  %v1858_v4 = vsub.f32 %v1581_v33, %v1763_v27 }
  0xcd   :  { %vm490_vm4 = vcmp.eq.s32.totalorder %v1783_v9, %v421_v6  ;;  %vm495_vm7 = vcmp.eq.s32.totalorder %v1783_v9, %v436_v22  ;;  %v1864_v6 = vsub.f32 %v1586_v34, %v1765_v32 }
  0xce   :  { %v515_v25 = vsel %vm490_vm4, %v1717_v28, 0.0  ;;  %v316_v28 = vsel %vm135_vm0, %v1316_v35, 0.0  ;;  %v520_v20 = vsel %vm495_vm7, %v1741_v53, 0.0  ;;  %v270_v34 = vmul.f32 1.442695, %v1858_v4 }
  0xcf   :  { %v544_v8 = vsel %vm135_vm0, %v515_v25, 0.0  ;;  %v268_v32 = vmul.f32 1.442695, %v1864_v6  ;;  %v1894_v35 = vsub.f32 %v1600_v38, %v1770_v44 }
  0xd0   :  { %620 = vadd.xlane.f32.xlu1 %v619_v11  ;;  %617 = vadd.xlane.f32.xlu0 %v616_v12  ;;  %v427_v15 = vpop.permute.xlu0 %426  ;;  %v1320_v62 = vpop.eup %1319  ;;  %v631_v11 = vsel %vm135_vm0, %v1744_v54, 0.0  ;;  %v628_v12 = vsel %vm135_vm0, %v1733_v48, 0.0  ;;  %1325 = vpow2.f32 %v270_v34 }
  0xd1   :  { %vm492_vm6 = vcmp.eq.s32.totalorder %v1783_v9, %v427_v15  ;;  %v1872_v15 = vsub.f32 %v1637_v49, %v1796_v60  ;;  %v439_v33 = vpop.permute.xlu1 %438  ;;  %v1322_v7 = vpop.eup %1321  ;;  %v559_v49 = vsel %vm135_vm0, %v520_v20, 0.0  ;;  %1327 = vpow2.f32 %v268_v32 }
  0xd2   :  { %v517_v16 = vsel %vm492_vm6, %v1736_v50, 0.0  ;;  %v322_v50 = vsel %vm135_vm0, %v1320_v62, 0.0  ;;  %v331_v24 = vsel %vm135_vm0, %v1322_v7, 0.0  ;;  %vm496_vm10 = vcmp.eq.s32.totalorder %v1783_v9, %v439_v33 }
  0xd3   :  { %v550_v14 = vsel %vm135_vm0, %v517_v16, 0.0  ;;  %v276_v62 = vmul.f32 1.442695, %v1916_v21  ;;  %v649_v33 = vsel %vm135_vm0, %v1812_v31, 0.0 }
  0xd4   :  { %548 = vadd.xlane.f32.xlu1 %v547_v26  ;;  %545 = vadd.xlane.f32.xlu0 %v544_v8  ;;  %v433_v43 = vpop.permute.xlu0 %432  ;;  %v1324_v23 = vpop.eup %1323  ;;  %v1888_v8 = vsub.f32 %v1595_v37, %v1768_v39  ;;  %v521_v39 = vsel %vm496_vm10, %v1749_v58, 0.0 }
  0xd5   :  { %vm494_vm8 = vcmp.eq.s32.totalorder %v1783_v9, %v433_v43  ;;  %v328_v26 = vsel %vm135_vm0, %v1324_v23, 0.0  ;;  %v637_v43 = vsel %vm135_vm0, %v1749_v58, 0.0  ;;  %v562_v44 = vsel %vm135_vm0, %v521_v39, 0.0 }
  0xd6   :  { %v519_v25 = vsel %vm494_vm8, %v1744_v54, 0.0  ;;  %v442_v54 = vpop.permute.xlu1 %441  ;;  %v1910_v58 = vsub.f32 %v1609_v41, %v1776_v47 }
  0xd7   :  { %v556_v60 = vsel %vm135_vm0, %v519_v25, 0.0  ;;  %vm497_vm11 = vcmp.eq.s32.totalorder %v1783_v9, %v442_v54 }
  0xd8   :  { %320 = vadd.xlane.f32.xlu1 %v319_v0  ;;  %317 = vadd.xlane.f32.xlu0 %v316_v28  ;;  %v1826_v5 = vpop.permute.xlu0 %450  ;;  %v522_v37 = vsel %vm497_vm11, %v1774_v1, 0.0  ;;  %v274_v28 = vmul.f32 1.442695, %v1888_v8  ;;  %v278_v47 = vmul.f32 1.442695, %v1910_v58  ;;  %vm1442_vm11 = vmmov 1  }
  0xd9   :  { %v565_v38 = vsel %vm135_vm0, %v522_v37, 0.0  ;;  %vm500_vm14 = vcmp.eq.s32.totalorder %v1783_v9, %v1826_v5 }
  0xda   :  { %v445_v0 = vpop.permute.xlu1 %444  ;;  %1329 = vpow2.f32 %v274_v28 }
  0xdb   :  { %vm498_vm12 = vcmp.eq.s32.totalorder %v1783_v9, %v445_v0 }
  0xdc   :  { %626 = vadd.xlane.f32.xlu1 %v625_v56  ;;  %623 = vadd.xlane.f32.xlu0 %v622_v59  ;;  %v1842_v13 = vpop.permute.xlu0 %468  ;;  %v272_v56 = vmul.f32 1.442695, %v1894_v35  ;;  %v1326_v59 = vpop.eup %1325  ;;  %v523_v41 = vsel %vm498_vm12, %v1792_v17, 0.0  ;;  %v1932_v17 = vsub.f32 %v1623_v45, %v1781_v52  ;;  %v525_v45 = vsel %vm500_vm14, %v1812_v31, 0.0 }
  0xdd   :  { %v1328_v29 = vpop.eup %1327  ;;  %v337_v16 = vsel %vm135_vm0, %v1326_v59, 0.0  ;;  %v568_v2 = vsel %vm135_vm0, %v523_v41, 0.0  ;;  %v655_v31 = vsel %vm135_vm0, %v1836_v10, 0.0  ;;  %vm506_vm5 = vcmp.eq.s32.totalorder %v1783_v9, %v1842_v13 }
  0xde   :  { %1331 = vpow2.f32 %v272_v56  ;;  %v448_v53 = vpop.permute.xlu1 %447  ;;  %v334_v61 = vsel %vm135_vm0, %v1328_v29, 0.0  ;;  %v282_v52 = vmul.f32 1.442695, %v1932_v17  ;;  %v658_v56 = vsel %vm135_vm0, %v1830_v51, 0.0 }
  0xdf   :  { %vm499_vm13 = vcmp.eq.s32.totalorder %v1783_v9, %v448_v53  ;;  %1333 = vpow2.f32 %v278_v47  ;;  %v667_v47 = vsel %vm135_vm0, %v1894_v35, 0.0 }
  0xe0   :  { %554 = vadd.xlane.f32.xlu1 %v553_v19  ;;  %551 = vadd.xlane.f32.xlu0 %v550_v14  ;;  %v1850_v40 = vpop.permute.xlu0 %474  ;;  %v640_v19 = vsel %vm135_vm0, %v1774_v1, 0.0  ;;  %v524_v14 = vsel %vm499_vm13, %v1788_v57, 0.0  ;;  %1335 = vpow2.f32 %v276_v62  ;;  %vm1043_vm13 = vcmask 7168  }
  0xe1   :  { %v571_v42 = vsel %vm135_vm0, %v524_v14, 0.0  ;;  %1337 = vpow2.f32 %v282_v52  ;;  %vm508_vm7 = vcmp.eq.s32.totalorder %v1783_v9, %v1850_v40 }
  0xe2   :  { %v454_v1 = vpop.permute.xlu1 %453  ;;  %v533_v41 = vsel %vm508_vm7, %v1916_v21, 0.0 }
  0xe3   :  { %vm501_vm15 = vcmp.eq.s32.totalorder %v1783_v9, %v454_v1  ;;  %v598_v62 = vsel %vm135_vm0, %v533_v41, 0.0 }
  0xe4   :  { %326 = vadd.xlane.f32.xlu1 %v325_v63  ;;  %323 = vadd.xlane.f32.xlu0 %v322_v50  ;;  %v1854_v3 = vpop.permute.xlu0 %480  ;;  %v1330_v22 = vpop.eup %1329  ;;  %v526_v20 = vsel %vm501_vm15, %v1807_v18, 0.0 }
  0xe5   :  { %v343_v50 = vsel %vm135_vm0, %v1330_v22, 0.0 }
  0xe6   :  { %v457_v25 = vpop.permute.xlu1 %456 }
  0xe7   :  { %vm502_vm1 = vcmp.eq.s32.totalorder %v1783_v9, %v457_v25  ;;  %v682_v25 = vsel %vm135_vm0, %v1932_v17, 0.0 }
  0xe8   :  { %632 = vadd.xlane.f32.xlu1 %v631_v11  ;;  %629 = vadd.xlane.f32.xlu0 %v628_v12  ;;  %v487_v27 = vpop.permute.xlu0 %486  ;;  %v1332_v63 = vpop.eup %1331  ;;  %v1939_v12 = vsub.f32 %v1628_v46, %v1785_v55  ;;  %v577_v46 = vsel %vm135_vm0, %v526_v20, 0.0  ;;  %v574_v55 = vsel %vm135_vm0, %v525_v45, 0.0  ;;  %v685_v45 = vsel %vm135_vm0, %v1872_v15, 0.0 }
  0xe9   :  { %vm512_vm9 = vcmp.eq.s32.totalorder %v1783_v9, %v487_v27  ;;  %v340_v11 = vsel %vm135_vm0, %v1332_v63, 0.0  ;;  %v646_v27 = vsel %vm135_vm0, %v1788_v57, 0.0  ;;  %v1334_v34 = vpop.eup %1333 }
  0xea   :  { %v1880_v48 = vsel %vm512_vm9, %v1872_v15, 0.0  ;;  %v280_v5 = vmul.f32 1.442695, %v1939_v12  ;;  %v1336_v32 = vpop.eup %1335  ;;  %v460_v57 = vpop.permute.xlu1 %459  ;;  %v349_v7 = vsel %vm135_vm0, %v1334_v34, 0.0  ;;  %vm510_vm9 = vcmp.eq.s32.totalorder %v1783_v9, %v1854_v3 }
  0xeb   :  { %vm503_vm2 = vcmp.eq.s32.totalorder %v1783_v9, %v460_v57 }
  0xec   :  { %560 = vadd.xlane.f32.xlu1 %v559_v49  ;;  %557 = vadd.xlane.f32.xlu0 %v556_v60  ;;  %1339 = vpow2.f32 %v280_v5  ;;  %v346_v49 = vsel %vm135_vm0, %v1336_v32, 0.0  ;;  %v652_v60 = vsel %vm135_vm0, %v1807_v18, 0.0  ;;  %v528_v23 = vsel %vm503_vm2, %v1830_v51, 0.0 }
  0xee   :  { %v463_v54 = vpop.permute.xlu1 %462 }
  0xef   :  { %vm504_vm3 = vcmp.eq.s32.totalorder %v1783_v9, %v463_v54 }
  0xf0   :  { %332 = vadd.xlane.f32.xlu1 %v331_v24  ;;  %329 = vadd.xlane.f32.xlu0 %v328_v26  ;;  %v527_v24 = vsel %vm502_vm1, %v1836_v10, 0.0  ;;  %v284_v26 = vmul.f32 1.442695, %v1872_v15  ;;  %v661_v10 = vsel %vm135_vm0, %v1864_v6, 0.0  ;;  %v529_v59 = vsel %vm504_vm3, %v1864_v6, 0.0 }
  0xf1   :  { %v580_v0 = vsel %vm135_vm0, %v527_v24, 0.0  ;;  %v586_v53 = vsel %vm135_vm0, %v529_v59, 0.0 }
  0xf2   :  { %1341 = vpow2.f32 %v284_v26  ;;  %v466_v39 = vpop.permute.xlu1 %465 }
  0xf3   :  { %vm505_vm4 = vcmp.eq.s32.totalorder %v1783_v9, %v466_v39 }
  0xf4   :  { %638 = vadd.xlane.f32.xlu1 %v637_v43  ;;  %635 = vadd.xlane.f32.xlu0 %v634_v36  ;;  %v1338_v43 = vpop.eup %1337  ;;  %v583_v36 = vsel %vm135_vm0, %v528_v23, 0.0 }
  0xf5   :  { %v355_v18 = vsel %vm135_vm0, %v1338_v43, 0.0 }
  0xf6   :  { %v1340_v37 = vpop.eup %1339 }
  0xf7   :  { %v352_v28 = vsel %vm135_vm0, %v1340_v37, 0.0 }
  0xf8   :  { %566 = vadd.xlane.f32.xlu1 %v565_v38  ;;  %563 = vadd.xlane.f32.xlu0 %v562_v44  ;;  %v530_v38 = vsel %vm505_vm4, %v1858_v4, 0.0  ;;  %v472_v44 = vpop.permute.xlu1 %471 }
  0xf9   :  { %v589_v29 = vsel %vm135_vm0, %v530_v38, 0.0  ;;  %vm507_vm6 = vcmp.eq.s32.totalorder %v1783_v9, %v472_v44 }
  0xfc   :  { %338 = vadd.xlane.f32.xlu1 %v337_v16  ;;  %335 = vadd.xlane.f32.xlu0 %v334_v61  ;;  %v1342_v16 = vpop.eup %1341  ;;  %v531_v61 = vsel %vm506_vm5, %v1894_v35, 0.0  ;;  %v478_v13 = vpop.permute.xlu1 %477  ;;  %v673_v35 = vsel %vm135_vm0, %v1916_v21, 0.0  ;;  %v679_v21 = vsel %vm135_vm0, %v1939_v12, 0.0 }
  0xfd   :  { %v358_v51 = vsel %vm135_vm0, %v1342_v16, 0.0  ;;  %v592_v6 = vsel %vm135_vm0, %v531_v61, 0.0  ;;  %vm509_vm8 = vcmp.eq.s32.totalorder %v1783_v9, %v478_v13 }
  0xfe   :  { %v534_v22 = vsel %vm509_vm8, %v1910_v58, 0.0 }
 0x100   :  { %644 = vadd.xlane.f32.xlu1 %v643_v30  ;;  %641 = vadd.xlane.f32.xlu0 %v640_v19  ;;  %v532_v30 = vsel %vm507_vm6, %v1888_v8, 0.0  ;;  %v664_v19 = vsel %vm135_vm0, %v1858_v4, 0.0  ;;  %v484_v40 = vpop.permute.xlu1 %483  ;;  %v670_v4 = vsel %vm135_vm0, %v1888_v8, 0.0  ;;  %v676_v8 = vsel %vm135_vm0, %v1910_v58, 0.0 }
 0x101   :  { %v595_v14 = vsel %vm135_vm0, %v532_v30, 0.0  ;;  %vm511_vm10 = vcmp.eq.s32.totalorder %v1783_v9, %v484_v40 }
 0x102   :  { %v536_v1 = vsel %vm511_vm10, %v1932_v17, 0.0 }
 0x104   :  { %572 = vadd.xlane.f32.xlu1 %v571_v42  ;;  %569 = vadd.xlane.f32.xlu0 %v568_v2  ;;  %v601_v42 = vsel %vm135_vm0, %v534_v22, 0.0  ;;  %v535_v2 = vsel %vm510_vm9, %v1939_v12, 0.0  ;;  %v1443_v22 = vmov 0.0  }
 0x105   :  { %v604_v63 = vsel %vm135_vm0, %v535_v2, 0.0 }
 0x108   :  { %344 = vadd.xlane.f32.xlu1 %v343_v50  ;;  %341 = vadd.xlane.f32.xlu0 %v340_v11  ;;  %v607_v11 = vsel %vm135_vm0, %v536_v1, 0.0 }
 0x10c   :  { %650 = vadd.xlane.f32.xlu1 %v649_v33  ;;  %647 = vadd.xlane.f32.xlu0 %v646_v27  ;;  %v610_v27 = vsel %vm135_vm0, %v1880_v48, 0.0 }
 0x110   :  { %578 = vadd.xlane.f32.xlu1 %v577_v46  ;;  %575 = vadd.xlane.f32.xlu0 %v574_v55 }
 0x114   :  { %350 = vadd.xlane.f32.xlu1 %v349_v7  ;;  %347 = vadd.xlane.f32.xlu0 %v346_v49 }
 0x118   :  { %656 = vadd.xlane.f32.xlu1 %v655_v31  ;;  %653 = vadd.xlane.f32.xlu0 %v652_v60 }
 0x11c   :  { %584 = vadd.xlane.f32.xlu1 %v583_v36  ;;  %581 = vadd.xlane.f32.xlu0 %v580_v0 }
 0x120   :  { %356 = vadd.xlane.f32.xlu1 %v355_v18  ;;  %353 = vadd.xlane.f32.xlu0 %v352_v28 }
 0x124   :  { %662 = vadd.xlane.f32.xlu1 %v661_v10  ;;  %659 = vadd.xlane.f32.xlu0 %v658_v56 }
 0x128   :  { %590 = vadd.xlane.f32.xlu1 %v589_v29  ;;  %587 = vadd.xlane.f32.xlu0 %v586_v53 }
 0x12c   :  { %359 = vadd.xlane.f32.xlu0 %v358_v51  ;;  %593 = vadd.xlane.f32.xlu1 %v592_v6 }
 0x12e   :  { %v288_v3 = vpop.xlane.xlu1 %287 }
 0x12f   :  { %1343 = vlog2.f32 %v288_v3 }
 0x130   :  { %665 = vadd.xlane.f32.xlu0 %v664_v19  ;;  %596 = vadd.xlane.f32.xlu1 %v595_v14 }
 0x132   :  { %v297_v33 = vpop.xlane.xlu1 %296 }
 0x133   :  { %v291_v50 = vpop.xlane.xlu0 %290 }
 0x134   :  { %668 = vadd.xlane.f32.xlu0 %v667_v47  ;;  %599 = vadd.xlane.f32.xlu1 %v598_v62  ;;  %1345 = vlog2.f32 %v291_v50 }
 0x136   :  { %v303_v20 = vpop.xlane.xlu1 %302 }
 0x137   :  { %v294_v9 = vpop.xlane.xlu0 %293 }
 0x138   :  { %671 = vadd.xlane.f32.xlu0 %v670_v4  ;;  %602 = vadd.xlane.f32.xlu1 %v601_v42  ;;  %1347 = vlog2.f32 %v294_v9 }
 0x139   :  { %v1344_v52 = vpop.eup %1343  ;;  %1349 = vlog2.f32 %v297_v33 }
 0x13a   :  { %v2016_v5 = vpop.xlane.xlu1 %308  ;;  %v362_v34 = vmul.f32 0.6931472, %v1344_v52 }
 0x13b   :  { %v300_v58 = vpop.xlane.xlu0 %299 }
 0x13c   :  { %674 = vadd.xlane.f32.xlu0 %v673_v35  ;;  %605 = vadd.xlane.f32.xlu1 %v604_v63  ;;  %v713_v32 = vmul.f32 13.0, %v362_v34  ;;  %1351 = vlog2.f32 %v300_v58 }
 0x13d   :  { %1353 = vlog2.f32 %v303_v20 }
 0x13e   :  { %v1346_v55 = vpop.eup %1345 }
 0x13f   :  { %v306_v12 = vpop.xlane.xlu0 %305  ;;  %v364_v31 = vmul.f32 0.6931472, %v1346_v55 }
 0x140   :  { %677 = vadd.xlane.f32.xlu0 %v676_v8  ;;  %608 = vadd.xlane.f32.xlu1 %v607_v11  ;;  %1355 = vlog2.f32 %v306_v12 }
 0x141   :  { %v714_v37 = vmul.f32 13.0, %v364_v31  ;;  %1357 = vlog2.f32 %v2016_v5 }
 0x142   :  { %v1348_v57 = vpop.eup %1347 }
 0x143   :  { %v2018_v17 = vpop.xlane.xlu0 %311  ;;  %v366_v60 = vmul.f32 0.6931472, %v1348_v57  ;;  %v1350_v39 = vpop.eup %1349 }
 0x144   :  { %680 = vadd.xlane.f32.xlu0 %v679_v21  ;;  %611 = vadd.xlane.f32.xlu1 %v610_v27  ;;  %v368_v29 = vmul.f32 0.6931472, %v1350_v39  ;;  %1359 = vlog2.f32 %v2018_v17 }
 0x145   :  { %v715_v0 = vmul.f32 13.0, %v366_v60 }
 0x146   :  { %v1352_v59 = vpop.eup %1351  ;;  %v716_v42 = vmul.f32 13.0, %v368_v29 }
 0x147   :  { %v370_v30 = vmul.f32 0.6931472, %v1352_v59 }
 0x148   :  { %683 = vadd.xlane.f32.xlu0 %v682_v25 }
 0x149   :  { %v717_v1 = vmul.f32 13.0, %v370_v30 }
 0x14c   :  { %686 = vadd.xlane.f32.xlu0 %v685_v45 }
 0x151   :  { %v540_v48 = vpop.xlane.xlu1 %539 }
 0x152   :  { %v688_v46 = vsub.f32 %v540_v48, %v362_v34 }
 0x154   :  { %v763_v15 = vmul.f32 0.89166665, %v688_v46 }
 0x155   :  { %v615_v7 = vpop.xlane.xlu1 %614 }
 0x156   :  { %v738_v49 = vsub.f32 %v615_v7, %v713_v32  ;;  %v1354_v32 = vpop.eup %1353 }
 0x158   :  { %v788_v23 = vmul.f32 0.008333334, %v738_v49 }
 0x159   :  { %v2020_v54 = vpop.xlane.xlu1 %314  ;;  %v543_v24 = vpop.xlane.xlu0 %542 }
 0x15a   :  { %v813_v26 = vadd.f32 %v788_v23, %v763_v15  ;;  %v689_v43 = vsub.f32 %v543_v24, %v364_v31  ;;  %v1356_v31 = vpop.eup %1355  ;;  %1361 = vlog2.f32 %v2020_v54 }
 0x15c   :  { %v838_v36 = vsub.f32 0.0, %v813_v26  ;;  %v764_v38 = vmul.f32 0.89166665, %v689_v43  ;;  %v372_v26 = vmul.f32 0.6931472, %v1354_v32 }
 0x15d   :  { %v621_v18 = vpop.xlane.xlu1 %620  ;;  %v618_v28 = vpop.xlane.xlu0 %617 }
 0x15e   :  { %v740_v10 = vsub.f32 %v621_v18, %v715_v0  ;;  %v739_v56 = vsub.f32 %v618_v28, %v714_v37  ;;  %vm942_vm0 = vweird.f32 %v838_v36  ;;  %v374_v0 = vmul.f32 0.6931472, %v1356_v31 }
 0x15f   :  { %vm967_vm12 = vmxor %vm942_vm0, %vm1442_vm11 }
 0x160   :  { %v789_v44 = vmul.f32 0.008333334, %v739_v56  ;;  %v790_v13 = vmul.f32 0.008333334, %v740_v10  ;;  %v1018_v62 = vsel %vm967_vm12, %v838_v36, 0.0  ;;  %v1257_v40 = vsel %vm967_vm12, 1.0, %v1443_v22 }
 0x161   :  { %v549_v53 = vpop.xlane.xlu1 %548  ;;  %v546_v16 = vpop.xlane.xlu0 %545  ;;  %v1044_v3 = vsel %vm1043_vm13, %v1018_v62, 0.0  ;;  %v1156_v50 = vsel %vm1043_vm13, %v1257_v40, 0.0  ;;  %v718_v56 = vmul.f32 13.0, %v372_v26 }
 0x162   :  { %v814_v61 = vadd.f32 %v789_v44, %v764_v38  ;;  %v691_v51 = vsub.f32 %v549_v53, %v368_v29  ;;  %v690_v6 = vsub.f32 %v546_v16, %v366_v60  ;;  %v719_v44 = vmul.f32 13.0, %v374_v0 }
 0x164   :  { %v839_v19 = vsub.f32 0.0, %v814_v61  ;;  %v765_v14 = vmul.f32 0.89166665, %v690_v6  ;;  %v766_v52 = vmul.f32 0.89166665, %v691_v51 }
 0x165   :  { %v2023_v41 = vpop.xlane.xlu1 %320  ;;  %v2025_v47 = vpop.xlane.xlu0 %317 }
 0x166   :  { %vm943_vm14 = vweird.f32 %v839_v19  ;;  %v815_v4 = vadd.f32 %v790_v13, %v765_v14  ;;  %1363 = vlog2.f32 %v2025_v47 }
 0x167   :  { %vm968_vm15 = vmxor %vm943_vm14, %vm1442_vm11  ;;  %1365 = vlog2.f32 %v2023_v41 }
 0x168   :  { %v1019_v2 = vsel %vm968_vm15, %v839_v19, 0.0  ;;  %v1258_v35 = vsel %vm968_vm15, 1.0, %v1443_v22  ;;  %v840_v63 = vsub.f32 0.0, %v815_v4  ;;  %v1358_v4 = vpop.eup %1357 }
 0x169   :  { %v1045_v8 = vsel %vm1043_vm13, %v1019_v2, 0.0  ;;  %v1157_v11 = vsel %vm1043_vm13, %v1258_v35, 0.0  ;;  %v627_v33 = vpop.xlane.xlu1 %626  ;;  %v624_v9 = vpop.xlane.xlu0 %623 }
 0x16a   :  { %v1046_v21 = vadd.f32 %v1045_v8, %v1044_v3  ;;  %v1158_v27 = vadd.f32 %v1157_v11, %v1156_v50  ;;  %vm944_vm1 = vweird.f32 %v840_v63  ;;  %v742_v20 = vsub.f32 %v627_v33, %v717_v1 }
 0x16b   :  { %vm969_vm2 = vmxor %vm944_vm1, %vm1442_vm11  ;;  %v741_v25 = vsub.f32 %v624_v9, %v716_v42  ;;  %v376_v11 = vmul.f32 0.6931472, %v1358_v4 }
 0x16c   :  { %v1020_v58 = vsel %vm969_vm2, %v840_v63, 0.0  ;;  %v1259_v45 = vsel %vm969_vm2, 1.0, %v1443_v22  ;;  %v792_v15 = vmul.f32 0.008333334, %v742_v20  ;;  %v1360_v63 = vpop.eup %1359 }
 0x16d   :  { %v1047_v12 = vsel %vm1043_vm13, %v1020_v58, 0.0  ;;  %v1159_v34 = vsel %vm1043_vm13, %v1259_v45, 0.0  ;;  %v791_v48 = vmul.f32 0.008333334, %v741_v25  ;;  %v555_v46 = vpop.xlane.xlu1 %554  ;;  %v552_v55 = vpop.xlane.xlu0 %551 }
 0x16e   :  { %v1048_v57 = vadd.f32 %v1047_v12, %v1046_v21  ;;  %v1160_v7 = vadd.f32 %v1159_v34, %v1158_v27  ;;  %v692_v49 = vsub.f32 %v552_v55, %v370_v30  ;;  %v693_v5 = vsub.f32 %v555_v46, %v372_v26 }
 0x16f   :  { %v816_v60 = vadd.f32 %v791_v48, %v766_v52  ;;  %v378_v21 = vmul.f32 0.6931472, %v1360_v63  ;;  %v720_v52 = vmul.f32 13.0, %v376_v11 }
 0x170   :  { %v767_v23 = vmul.f32 0.89166665, %v692_v49  ;;  %v768_v30 = vmul.f32 0.89166665, %v693_v5 }
 0x171   :  { %v841_v24 = vsub.f32 0.0, %v816_v60  ;;  %v2040_v43 = vpop.xlane.xlu1 %326  ;;  %v2042_v36 = vpop.xlane.xlu0 %323  ;;  %v721_v48 = vmul.f32 13.0, %v378_v21 }
 0x172   :  { %v817_v37 = vadd.f32 %v792_v15, %v767_v23  ;;  %1367 = vlog2.f32 %v2042_v36 }
 0x173   :  { %vm945_vm3 = vweird.f32 %v841_v24  ;;  %1369 = vlog2.f32 %v2040_v43 }
 0x174   :  { %vm970_vm4 = vmxor %vm945_vm3, %vm1442_vm11  ;;  %v842_v39 = vsub.f32 0.0, %v817_v37 }
 0x175   :  { %v1021_v18 = vsel %vm970_vm4, %v841_v24, 0.0  ;;  %v1260_v28 = vsel %vm970_vm4, 1.0, %v1443_v22  ;;  %v633_v10 = vpop.xlane.xlu1 %632  ;;  %v630_v59 = vpop.xlane.xlu0 %629 }
 0x176   :  { %v1049_v17 = vsel %vm1043_vm13, %v1021_v18, 0.0  ;;  %v1161_v38 = vsel %vm1043_vm13, %v1260_v28, 0.0  ;;  %vm946_vm5 = vweird.f32 %v842_v39  ;;  %v743_v16 = vsub.f32 %v630_v59, %v718_v56 }
 0x177   :  { %v1050_v29 = vadd.f32 %v1049_v17, %v1048_v57  ;;  %v1162_v53 = vadd.f32 %v1161_v38, %v1160_v7  ;;  %vm971_vm6 = vmxor %vm946_vm5, %vm1442_vm11  ;;  %v744_v6 = vsub.f32 %v633_v10, %v719_v44 }
 0x178   :  { %v1022_v61 = vsel %vm971_vm6, %v842_v39, 0.0  ;;  %v1261_v51 = vsel %vm971_vm6, 1.0, %v1443_v22  ;;  %v793_v14 = vmul.f32 0.008333334, %v743_v16 }
 0x179   :  { %v1051_v13 = vsel %vm1043_vm13, %v1022_v61, 0.0  ;;  %v1163_v19 = vsel %vm1043_vm13, %v1261_v51, 0.0  ;;  %v561_v62 = vpop.xlane.xlu1 %560  ;;  %v558_v40 = vpop.xlane.xlu0 %557  ;;  %v794_v3 = vmul.f32 0.008333334, %v744_v6 }
 0x17a   :  { %v1052_v42 = vadd.f32 %v1051_v13, %v1050_v29  ;;  %v1164_v2 = vadd.f32 %v1163_v19, %v1162_v53  ;;  %v694_v35 = vsub.f32 %v558_v40, %v374_v0  ;;  %v818_v1 = vadd.f32 %v793_v14, %v768_v30  ;;  %v1362_v0 = vpop.eup %1361 }
 0x17b   :  { %v695_v54 = vsub.f32 %v561_v62, %v376_v11  ;;  %v1364_v28 = vpop.eup %1363  ;;  %v380_v17 = vmul.f32 0.6931472, %v1362_v0 }
 0x17c   :  { %v769_v50 = vmul.f32 0.89166665, %v694_v35  ;;  %v843_v8 = vsub.f32 0.0, %v818_v1  ;;  %v382_v29 = vmul.f32 0.6931472, %v1364_v28 }
 0x17d   :  { %v2054_v33 = vpop.xlane.xlu1 %332  ;;  %v2056_v9 = vpop.xlane.xlu0 %329  ;;  %v770_v31 = vmul.f32 0.89166665, %v695_v54  ;;  %v722_v30 = vmul.f32 13.0, %v380_v17 }
 0x17e   :  { %v819_v27 = vadd.f32 %v794_v3, %v769_v50  ;;  %vm947_vm7 = vweird.f32 %v843_v8  ;;  %v723_v14 = vmul.f32 13.0, %v382_v29  ;;  %1371 = vlog2.f32 %v2056_v9 }
 0x17f   :  { %vm972_vm8 = vmxor %vm947_vm7, %vm1442_vm11  ;;  %1373 = vlog2.f32 %v2054_v33 }
 0x180   :  { %v844_v20 = vsub.f32 0.0, %v819_v27  ;;  %v1023_v25 = vsel %vm972_vm8, %v843_v8, 0.0  ;;  %v1262_v58 = vsel %vm972_vm8, 1.0, %v1443_v22 }
 0x181   :  { %v639_v45 = vpop.xlane.xlu1 %638  ;;  %v636_v12 = vpop.xlane.xlu0 %635  ;;  %v1053_v47 = vsel %vm1043_vm13, %v1023_v25, 0.0  ;;  %v1165_v34 = vsel %vm1043_vm13, %v1262_v58, 0.0 }
 0x182   :  { %vm948_vm9 = vweird.f32 %v844_v20  ;;  %v1054_v46 = vadd.f32 %v1053_v47, %v1052_v42  ;;  %v1166_v55 = vadd.f32 %v1165_v34, %v1164_v2  ;;  %v745_v32 = vsub.f32 %v636_v12, %v720_v52 }
 0x183   :  { %vm973_vm10 = vmxor %vm948_vm9, %vm1442_vm11  ;;  %v746_v49 = vsub.f32 %v639_v45, %v721_v48 }
 0x184   :  { %v1024_v57 = vsel %vm973_vm10, %v844_v20, 0.0  ;;  %v1263_v7 = vsel %vm973_vm10, 1.0, %v1443_v22  ;;  %v795_v23 = vmul.f32 0.008333334, %v745_v32 }
 0x185   :  { %v1055_v60 = vsel %vm1043_vm13, %v1024_v57, 0.0  ;;  %v1167_v15 = vsel %vm1043_vm13, %v1263_v7, 0.0  ;;  %v567_v24 = vpop.xlane.xlu1 %566  ;;  %v564_v26 = vpop.xlane.xlu0 %563  ;;  %v796_v10 = vmul.f32 0.008333334, %v746_v49 }
 0x186   :  { %v1056_v37 = vadd.f32 %v1055_v60, %v1054_v46  ;;  %v1168_v39 = vadd.f32 %v1167_v15, %v1166_v55  ;;  %v696_v18 = vsub.f32 %v564_v26, %v378_v21  ;;  %v820_v5 = vadd.f32 %v795_v23, %v770_v31  ;;  %v1366_v21 = vpop.eup %1365 }
 0x187   :  { %v697_v41 = vsub.f32 %v567_v24, %v380_v17  ;;  %v1368_v58 = vpop.eup %1367  ;;  %v384_v47 = vmul.f32 0.6931472, %v1366_v21 }
 0x188   :  { %v771_v56 = vmul.f32 0.89166665, %v696_v18  ;;  %v845_v59 = vsub.f32 0.0, %v820_v5  ;;  %v386_v46 = vmul.f32 0.6931472, %v1368_v58 }
 0x189   :  { %v2068_v38 = vpop.xlane.xlu1 %338  ;;  %v2070_v44 = vpop.xlane.xlu0 %335  ;;  %v772_v63 = vmul.f32 0.89166665, %v697_v41  ;;  %v724_v60 = vmul.f32 13.0, %v384_v47 }
 0x18a   :  { %v821_v53 = vadd.f32 %v796_v10, %v771_v56  ;;  %vm949_vm0 = vweird.f32 %v845_v59  ;;  %v725_v26 = vmul.f32 13.0, %v386_v46  ;;  %1375 = vlog2.f32 %v2070_v44 }
 0x18b   :  { %vm974_vm12 = vmxor %vm949_vm0, %vm1442_vm11  ;;  %1377 = vlog2.f32 %v2068_v38 }
 0x18c   :  { %v846_v16 = vsub.f32 0.0, %v821_v53  ;;  %v1025_v61 = vsel %vm974_vm12, %v845_v59, 0.0  ;;  %v1264_v51 = vsel %vm974_vm12, 1.0, %v1443_v22 }
 0x18d   :  { %v645_v6 = vpop.xlane.xlu1 %644  ;;  %v642_v13 = vpop.xlane.xlu0 %641  ;;  %v1057_v36 = vsel %vm1043_vm13, %v1025_v61, 0.0  ;;  %v1169_v19 = vsel %vm1043_vm13, %v1264_v51, 0.0 }
 0x18e   :  { %vm950_vm14 = vweird.f32 %v846_v16  ;;  %v1058_v62 = vadd.f32 %v1057_v36, %v1056_v37  ;;  %v1170_v40 = vadd.f32 %v1169_v19, %v1168_v39  ;;  %v747_v4 = vsub.f32 %v642_v13, %v722_v30 }
 0x18f   :  { %vm975_vm15 = vmxor %vm950_vm14, %vm1442_vm11  ;;  %v748_v35 = vsub.f32 %v645_v6, %v723_v14  ;;  %v1370_v6 = vpop.eup %1369 }
 0x190   :  { %v1026_v42 = vsel %vm975_vm15, %v846_v16, 0.0  ;;  %v1265_v2 = vsel %vm975_vm15, 1.0, %v1443_v22  ;;  %v797_v50 = vmul.f32 0.008333334, %v747_v4  ;;  %v388_v14 = vmul.f32 0.6931472, %v1370_v6  ;;  %v1372_v33 = vpop.eup %1371 }
 0x191   :  { %v1059_v1 = vsel %vm1043_vm13, %v1026_v42, 0.0  ;;  %v1171_v3 = vsel %vm1043_vm13, %v1265_v2, 0.0  ;;  %v573_v8 = vpop.xlane.xlu1 %572  ;;  %v570_v11 = vpop.xlane.xlu0 %569  ;;  %v798_v45 = vmul.f32 0.008333334, %v748_v35  ;;  %v390_v58 = vmul.f32 0.6931472, %v1372_v33 }
 0x192   :  { %v1060_v27 = vadd.f32 %v1059_v1, %v1058_v62  ;;  %v1172_v20 = vadd.f32 %v1171_v3, %v1170_v40  ;;  %v698_v25 = vsub.f32 %v570_v11, %v382_v29  ;;  %v822_v54 = vadd.f32 %v797_v50, %v772_v63 }
 0x193   :  { %v699_v49 = vsub.f32 %v573_v8, %v384_v47  ;;  %v726_v8 = vmul.f32 13.0, %v388_v14 }
 0x194   :  { %v773_v52 = vmul.f32 0.89166665, %v698_v25  ;;  %v847_v12 = vsub.f32 0.0, %v822_v54  ;;  %v1374_v25 = vpop.eup %1373 }
 0x195   :  { %v2080_v34 = vpop.xlane.xlu1 %344  ;;  %v2082_v48 = vpop.xlane.xlu0 %341  ;;  %v774_v5 = vmul.f32 0.89166665, %v699_v49  ;;  %v392_v47 = vmul.f32 0.6931472, %v1374_v25 }
 0x196   :  { %v823_v55 = vadd.f32 %v798_v45, %v773_v52  ;;  %vm951_vm1 = vweird.f32 %v847_v12  ;;  %1379 = vlog2.f32 %v2082_v48 }
 0x197   :  { %vm976_vm2 = vmxor %vm951_vm1, %vm1442_vm11  ;;  %1381 = vlog2.f32 %v2080_v34 }
 0x198   :  { %v848_v32 = vsub.f32 0.0, %v823_v55  ;;  %v1027_v57 = vsel %vm976_vm2, %v847_v12, 0.0  ;;  %v1266_v7 = vsel %vm976_vm2, 1.0, %v1443_v22 }
 0x199   :  { %v651_v31 = vpop.xlane.xlu1 %650  ;;  %v648_v15 = vpop.xlane.xlu0 %647  ;;  %v1061_v23 = vsel %vm1043_vm13, %v1027_v57, 0.0  ;;  %v1173_v24 = vsel %vm1043_vm13, %v1266_v7, 0.0  ;;  %v727_v57 = vmul.f32 13.0, %v390_v58 }
 0x19a   :  { %vm952_vm3 = vweird.f32 %v848_v32  ;;  %v1062_v0 = vadd.f32 %v1061_v23, %v1060_v27  ;;  %v1174_v37 = vadd.f32 %v1173_v24, %v1172_v20  ;;  %v749_v43 = vsub.f32 %v648_v15, %v724_v60 }
 0x19b   :  { %vm977_vm4 = vmxor %vm952_vm3, %vm1442_vm11  ;;  %v750_v28 = vsub.f32 %v651_v31, %v725_v26  ;;  %v728_v24 = vmul.f32 13.0, %v392_v47 }
 0x19c   :  { %v1028_v39 = vsel %vm977_vm4, %v848_v32, 0.0  ;;  %v1267_v18 = vsel %vm977_vm4, 1.0, %v1443_v22  ;;  %v799_v59 = vmul.f32 0.008333334, %v749_v43  ;;  %v1376_v32 = vpop.eup %1375 }
 0x19d   :  { %v1063_v10 = vsel %vm1043_vm13, %v1028_v39, 0.0  ;;  %v1175_v56 = vsel %vm1043_vm13, %v1267_v18, 0.0  ;;  %v579_v17 = vpop.xlane.xlu1 %578  ;;  %v576_v29 = vpop.xlane.xlu0 %575  ;;  %v800_v41 = vmul.f32 0.008333334, %v750_v28  ;;  %v394_v15 = vmul.f32 0.6931472, %v1376_v32 }
 0x19e   :  { %v1064_v53 = vadd.f32 %v1063_v10, %v1062_v0  ;;  %v1176_v16 = vadd.f32 %v1175_v56, %v1174_v37  ;;  %v700_v61 = vsub.f32 %v576_v29, %v386_v46  ;;  %v824_v51 = vadd.f32 %v799_v59, %v774_v5  ;;  %v1378_v10 = vpop.eup %1377 }
 0x19f   :  { %v701_v12 = vsub.f32 %v579_v17, %v388_v14  ;;  %v729_v18 = vmul.f32 13.0, %v394_v15 }
 0x1a0   :  { %v775_v9 = vmul.f32 0.89166665, %v700_v61  ;;  %v849_v30 = vsub.f32 0.0, %v824_v51 }
 0x1a1   :  { %v351_v13 = vpop.xlane.xlu1 %350  ;;  %v348_v36 = vpop.xlane.xlu0 %347  ;;  %v776_v31 = vmul.f32 0.89166665, %v701_v12 }
 0x1a2   :  { %v825_v19 = vadd.f32 %v800_v41, %v775_v9  ;;  %vm953_vm5 = vweird.f32 %v849_v30  ;;  %1383 = vlog2.f32 %v351_v13 }
 0x1a3   :  { %vm978_vm6 = vmxor %vm953_vm5, %vm1442_vm11  ;;  %1385 = vlog2.f32 %v348_v36 }
 0x1a4   :  { %v850_v62 = vsub.f32 0.0, %v825_v19  ;;  %v1029_v40 = vsel %vm978_vm6, %v849_v30, 0.0  ;;  %v1268_v4 = vsel %vm978_vm6, 1.0, %v1443_v22 }
 0x1a5   :  { %v657_v42 = vpop.xlane.xlu1 %656  ;;  %v654_v2 = vpop.xlane.xlu0 %653  ;;  %v1065_v35 = vsel %vm1043_vm13, %v1029_v40, 0.0  ;;  %v1177_v63 = vsel %vm1043_vm13, %v1268_v4, 0.0 }
 0x1a6   :  { %vm954_vm7 = vweird.f32 %v850_v62  ;;  %v1066_v1 = vadd.f32 %v1065_v35, %v1064_v53  ;;  %v1178_v3 = vadd.f32 %v1177_v63, %v1176_v16  ;;  %v751_v52 = vsub.f32 %v654_v2, %v726_v8  ;;  %v1380_v53 = vpop.eup %1379 }
 0x1a7   :  { %vm979_vm8 = vmxor %vm954_vm7, %vm1442_vm11  ;;  %v752_v60 = vsub.f32 %v657_v42, %v727_v57  ;;  %v396_v16 = vmul.f32 0.6931472, %v1378_v10  ;;  %v1382_v30 = vpop.eup %1381  ;;  %v398_v36 = vmul.f32 0.6931472, %v1380_v53 }
 0x1a8   :  { %v1030_v44 = vsel %vm979_vm8, %v850_v62, 0.0  ;;  %v1269_v50 = vsel %vm979_vm8, 1.0, %v1443_v22  ;;  %v801_v7 = vmul.f32 0.008333334, %v751_v52  ;;  %v400_v35 = vmul.f32 0.6931472, %v1382_v30 }
 0x1a9   :  { %v1067_v11 = vsel %vm1043_vm13, %v1030_v44, 0.0  ;;  %v1179_v21 = vsel %vm1043_vm13, %v1269_v50, 0.0  ;;  %v585_v27 = vpop.xlane.xlu1 %584  ;;  %v582_v20 = vpop.xlane.xlu0 %581  ;;  %v802_v43 = vmul.f32 0.008333334, %v752_v60  ;;  %v730_v4 = vmul.f32 13.0, %v396_v16 }
 0x1aa   :  { %v2104_v54 = vadd.f32 %v1067_v11, %v1066_v1  ;;  %v2106_v45 = vadd.f32 %v1179_v21, %v1178_v3  ;;  %v702_v49 = vsub.f32 %v582_v20, %v390_v58  ;;  %v826_v0 = vadd.f32 %v801_v7, %v776_v31 }
 0x1ab   :  { %v703_v39 = vsub.f32 %v585_v27, %v392_v47  ;;  %v731_v50 = vmul.f32 13.0, %v398_v36  ;;  %v732_v12 = vmul.f32 13.0, %v400_v35 }
 0x1ac   :  { %v777_v38 = vmul.f32 0.89166665, %v702_v49  ;;  %v851_v48 = vsub.f32 0.0, %v826_v0  ;;  %v1384_v2 = vpop.eup %1383 }
 0x1ad   :  { %v357_v46 = vpop.xlane.xlu1 %356  ;;  %v354_v55 = vpop.xlane.xlu0 %353  ;;  %v778_v34 = vmul.f32 0.89166665, %v703_v39  ;;  %v2126_v52 = vmul.f32 0.6931472, %v1384_v2 }
 0x1ae   :  { %v827_v56 = vadd.f32 %v802_v43, %v777_v38  ;;  %vm955_vm9 = vweird.f32 %v851_v48  ;;  %1387 = vlog2.f32 %v357_v46  ;;  %v1386_v63 = vpop.eup %1385 }
 0x1af   :  { %vm2112_vm10 = vmxor %vm955_vm9, %vm1442_vm11  ;;  %1389 = vlog2.f32 %v354_v55  ;;  %v402_v32 = vmul.f32 0.6931472, %v1386_v63  ;;  %v734_v39 = vmul.f32 13.0, %v2126_v52 }
 0x1b0   :  { %v852_v9 = vsub.f32 0.0, %v827_v56  ;;  %v1031_v3 = vsel %vm2112_vm10, %v851_v48, 0.0  ;;  %v1270_v46 = vsel %vm2112_vm10, 1.0, %v1443_v22 }
 0x1b1   :  { %v663_v23 = vpop.xlane.xlu1 %662  ;;  %v660_v26 = vpop.xlane.xlu0 %659  ;;  %v1069_v47 = vsel %vm1043_vm13, %v1031_v3, 0.0  ;;  %v733_v48 = vmul.f32 13.0, %v402_v32 }
 0x1b2   :  { %v753_v37 = vsub.f32 %v660_v26, %v728_v24  ;;  %v754_v29 = vsub.f32 %v663_v23, %v729_v18  ;;  %vm956_vm0 = vweird.f32 %v852_v9 }
 0x1b3   :  { %vm2121_vm12 = vmxor %vm956_vm0, %vm1442_vm11 }
 0x1b4   :  { %v803_v59 = vmul.f32 0.008333334, %v753_v37  ;;  %v804_v13 = vmul.f32 0.008333334, %v754_v29  ;;  %v1032_v57 = vsel %vm2121_vm12, %v852_v9, 0.0  ;;  %v1271_v38 = vsel %vm2121_vm12, 1.0, %v1443_v22 }
 0x1b5   :  { %v591_v28 = vpop.xlane.xlu1 %590  ;;  %v588_v5 = vpop.xlane.xlu0 %587  ;;  %v1071_v10 = vsel %vm1043_vm13, %v1032_v57, 0.0 }
 0x1b6   :  { %v704_v17 = vsub.f32 %v588_v5, %v394_v15  ;;  %v828_v6 = vadd.f32 %v803_v59, %v778_v34  ;;  %v705_v14 = vsub.f32 %v591_v28, %v396_v16  ;;  %v1070_v28 = vadd.f32 %v1069_v47, %v2104_v54 }
 0x1b7   :  { %v1181_v5 = vsel %vm1043_vm13, %v1270_v46, 0.0  ;;  %v1183_v54 = vsel %vm1043_vm13, %v1271_v38, 0.0 }
 0x1b8   :  { %v779_v61 = vmul.f32 0.89166665, %v704_v17  ;;  %v853_v33 = vsub.f32 0.0, %v828_v6  ;;  %v780_v11 = vmul.f32 0.89166665, %v705_v14  ;;  %v1388_v0 = vpop.eup %1387 }
 0x1b9   :  { %v594_v51 = vpop.xlane.xlu1 %593  ;;  %v360_v41 = vpop.xlane.xlu0 %359 }
 0x1ba   :  { %v2116_v62 = vadd.f32 %v804_v13, %v779_v61  ;;  %v706_v44 = vsub.f32 %v594_v51, %v398_v36  ;;  %vm957_vm14 = vweird.f32 %v853_v33  ;;  %1391 = vlog2.f32 %v360_v41  ;;  %v1390_v18 = vpop.eup %1389 }
 0x1bb   :  { %vm2135_vm15 = vmxor %vm957_vm14, %vm1442_vm11  ;;  %v1182_v41 = vadd.f32 %v1181_v5, %v2106_v45  ;;  %v406_v30 = vmul.f32 0.6931472, %v1390_v18  ;;  %v2168_v13 = vmul.f32 0.6931472, %v1388_v0 }
 0x1bc   :  { %v854_v21 = vsub.f32 0.0, %v2116_v62  ;;  %v781_v7 = vmul.f32 0.89166665, %v706_v44  ;;  %v1033_v56 = vsel %vm2135_vm15, %v853_v33, 0.0  ;;  %v1272_v53 = vsel %vm2135_vm15, 1.0, %v1443_v22 }
 0x1bd   :  { %v597_v40 = vpop.xlane.xlu1 %596  ;;  %v666_v42 = vpop.xlane.xlu0 %665  ;;  %v1073_v36 = vsel %vm1043_vm13, %v1033_v56, 0.0  ;;  %v1072_v62 = vadd.f32 %v1071_v10, %v1070_v28  ;;  %v735_v8 = vmul.f32 13.0, %v406_v30 }
 0x1be   :  { %v755_v1 = vsub.f32 %v666_v42, %v730_v4  ;;  %v707_v49 = vsub.f32 %v597_v40, %v400_v35  ;;  %vm2139_vm1 = vweird.f32 %v854_v21  ;;  %v1184_v40 = vadd.f32 %v1183_v54, %v1182_v41 }
 0x1bf   :  { %vm2155_vm2 = vmxor %vm2139_vm1, %vm1442_vm11  ;;  %v1185_v4 = vsel %vm1043_vm13, %v1272_v53, 0.0  ;;  %v1074_v3 = vadd.f32 %v1073_v36, %v1072_v62 }
 0x1c0   :  { %v805_v27 = vmul.f32 0.008333334, %v755_v1  ;;  %v782_v17 = vmul.f32 0.89166665, %v707_v49  ;;  %v1034_v19 = vsel %vm2155_vm2, %v854_v21, 0.0  ;;  %v1273_v2 = vsel %vm2155_vm2, 1.0, %v1443_v22 }
 0x1c1   :  { %v600_v20 = vpop.xlane.xlu1 %599  ;;  %v669_v25 = vpop.xlane.xlu0 %668  ;;  %v1075_v44 = vsel %vm1043_vm13, %v1034_v19, 0.0 }
 0x1c2   :  { %v756_v58 = vsub.f32 %v669_v25, %v731_v50  ;;  %v830_v55 = vadd.f32 %v805_v27, %v780_v11  ;;  %v708_v61 = vsub.f32 %v600_v20, %v402_v32  ;;  %v736_v11 = vmul.f32 13.0, %v2168_v13 }
 0x1c3   :  { %v1076_v60 = vadd.f32 %v1075_v44, %v1074_v3 }
 0x1c4   :  { %v806_v31 = vmul.f32 0.008333334, %v756_v58  ;;  %v855_v23 = vsub.f32 0.0, %v830_v55  ;;  %v783_v33 = vmul.f32 0.89166665, %v708_v61  ;;  %v1392_v21 = vpop.eup %1391 }
 0x1c5   :  { %v603_v24 = vpop.xlane.xlu1 %602  ;;  %v672_v26 = vpop.xlane.xlu0 %671 }
 0x1c6   :  { %v831_v37 = vadd.f32 %v806_v31, %v781_v7  ;;  %v757_v43 = vsub.f32 %v672_v26, %v732_v12  ;;  %vm2163_vm3 = vweird.f32 %v855_v23  ;;  %v709_v35 = vsub.f32 %v603_v24, %v2126_v52 }
 0x1c7   :  { %vm2177_vm5 = vmxor %vm2163_vm3, %vm1442_vm11  ;;  %v1186_v52 = vadd.f32 %v1185_v4, %v1184_v40  ;;  %v1187_v12 = vsel %vm1043_vm13, %v1273_v2, 0.0  ;;  %v410_v24 = vmul.f32 0.6931472, %v1392_v21 }
 0x1c8   :  { %v856_v29 = vsub.f32 0.0, %v831_v37  ;;  %v807_v34 = vmul.f32 0.008333334, %v757_v43  ;;  %v1035_v27 = vsel %vm2177_vm5, %v855_v23, 0.0  ;;  %v1274_v47 = vsel %vm2177_vm5, 1.0, %v1443_v22 }
 0x1c9   :  { %v675_v51 = vpop.xlane.xlu0 %674  ;;  %v606_v6 = vpop.xlane.xlu1 %605  ;;  %v784_v57 = vmul.f32 0.89166665, %v709_v35  ;;  %v1077_v15 = vsel %vm1043_vm13, %v1035_v27, 0.0  ;;  %v1189_v0 = vsel %vm1043_vm13, %v1274_v47, 0.0  ;;  %v1188_v5 = vadd.f32 %v1187_v12, %v1186_v52 }
 0x1ca   :  { %v832_v9 = vadd.f32 %v807_v34, %v782_v17  ;;  %vm960_vm4 = vweird.f32 %v856_v29  ;;  %v758_v14 = vsub.f32 %v675_v51, %v733_v48  ;;  %v710_v46 = vsub.f32 %v606_v6, %v406_v30 }
 0x1cb   :  { %vm2187_vm6 = vmxor %vm960_vm4, %vm1442_vm11  ;;  %v1078_v10 = vadd.f32 %v1077_v15, %v1076_v60  ;;  %v737_v16 = vmul.f32 13.0, %v410_v24  ;;  %v1190_v61 = vadd.f32 %v1189_v0, %v1188_v5 }
 0x1cc   :  { %v857_v42 = vsub.f32 0.0, %v832_v9  ;;  %v808_v63 = vmul.f32 0.008333334, %v758_v14  ;;  %v1036_v32 = vsel %vm2187_vm6, %v856_v29, 0.0  ;;  %v1275_v38 = vsel %vm2187_vm6, 1.0, %v1443_v22 }
 0x1cd   :  { %v678_v1 = vpop.xlane.xlu0 %677  ;;  %v609_v55 = vpop.xlane.xlu1 %608  ;;  %v1079_v43 = vsel %vm1043_vm13, %v1036_v32, 0.0  ;;  %v1191_v41 = vsel %vm1043_vm13, %v1275_v38, 0.0 }
 0x1ce   :  { %vm2194_vm7 = vweird.f32 %v857_v42  ;;  %v833_v25 = vadd.f32 %v808_v63, %v783_v33  ;;  %v759_v58 = vsub.f32 %v678_v1, %v734_v39  ;;  %v785_v39 = vmul.f32 0.89166665, %v710_v46 }
 0x1cf   :  { %vm2208_vm8 = vmxor %vm2194_vm7, %vm1442_vm11  ;;  %v711_v18 = vsub.f32 %v609_v55, %v2168_v13  ;;  %v1080_v51 = vadd.f32 %v1079_v43, %v1078_v10  ;;  %v1192_v4 = vadd.f32 %v1191_v41, %v1190_v61 }
 0x1d0   :  { %v858_v7 = vsub.f32 0.0, %v833_v25  ;;  %v809_v49 = vmul.f32 0.008333334, %v759_v58  ;;  %v1037_v48 = vsel %vm2208_vm8, %v857_v42, 0.0  ;;  %v1276_v17 = vsel %vm2208_vm8, 1.0, %v1443_v22 }
 0x1d1   :  { %v681_v31 = vpop.xlane.xlu0 %680  ;;  %v612_v34 = vpop.xlane.xlu1 %611  ;;  %v1081_v9 = vsel %vm1043_vm13, %v1037_v48, 0.0  ;;  %v786_v6 = vmul.f32 0.89166665, %v711_v18  ;;  %v1193_v36 = vsel %vm1043_vm13, %v1276_v17, 0.0 }
 0x1d2   :  { %v760_v26 = vsub.f32 %v681_v31, %v735_v8  ;;  %vm962_vm9 = vweird.f32 %v858_v7  ;;  %v834_v37 = vadd.f32 %v809_v49, %v784_v57  ;;  %v712_v62 = vsub.f32 %v612_v34, %v410_v24 }
 0x1d3   :  { %vm2224_vm10 = vmxor %vm962_vm9, %vm1442_vm11  ;;  %v1082_v42 = vadd.f32 %v1081_v9, %v1080_v51  ;;  %v1194_v63 = vadd.f32 %v1193_v36, %v1192_v4 }
 0x1d4   :  { %v810_v28 = vmul.f32 0.008333334, %v760_v26  ;;  %v859_v56 = vsub.f32 0.0, %v834_v37  ;;  %v1038_v19 = vsel %vm2224_vm10, %v858_v7, 0.0  ;;  %v1277_v14 = vsel %vm2224_vm10, 1.0, %v1443_v22 }
 0x1d5   :  { %v684_v59 = vpop.xlane.xlu0 %683  ;;  %v1083_v1 = vsel %vm1043_vm13, %v1038_v19, 0.0  ;;  %v1195_v3 = vsel %vm1043_vm13, %v1277_v14, 0.0  ;;  %v787_v50 = vmul.f32 0.89166665, %v712_v62 }
 0x1d6   :  { %v835_v54 = vadd.f32 %v810_v28, %v785_v39  ;;  %v761_v53 = vsub.f32 %v684_v59, %v736_v11  ;;  %vm963_vm0 = vweird.f32 %v859_v56  ;;  %v1084_v25 = vadd.f32 %v1083_v1, %v1082_v42 }
 0x1d7   :  { %vm988_vm12 = vmxor %vm963_vm0, %vm1442_vm11  ;;  %v1196_v58 = vadd.f32 %v1195_v3, %v1194_v63 }
 0x1d8   :  { %v860_v30 = vsub.f32 0.0, %v835_v54  ;;  %v811_v13 = vmul.f32 0.008333334, %v761_v53  ;;  %v1039_v2 = vsel %vm988_vm12, %v859_v56, 0.0  ;;  %v1278_v33 = vsel %vm988_vm12, 1.0, %v1443_v22 }
 0x1d9   :  { %v687_v40 = vpop.xlane.xlu0 %686  ;;  %v1085_v27 = vsel %vm1043_vm13, %v1039_v2, 0.0  ;;  %v1197_v20 = vsel %vm1043_vm13, %v1278_v33, 0.0 }
 0x1da   :  { %vm964_vm14 = vweird.f32 %v860_v30  ;;  %v836_v45 = vadd.f32 %v811_v13, %v786_v6  ;;  %v762_v35 = vsub.f32 %v687_v40, %v737_v16  ;;  %v1086_v32 = vadd.f32 %v1085_v27, %v1084_v25 }
 0x1db   :  { %vm989_vm15 = vmxor %vm964_vm14, %vm1442_vm11  ;;  %v1198_v57 = vadd.f32 %v1197_v20, %v1196_v58 }
 0x1dc   :  { %v861_v44 = vsub.f32 0.0, %v836_v45  ;;  %v1040_v8 = vsel %vm989_vm15, %v860_v30, 0.0  ;;  %v1279_v11 = vsel %vm989_vm15, 1.0, %v1443_v22  ;;  %v812_v21 = vmul.f32 0.008333334, %v762_v35 }
 0x1dd   :  { %v1087_v12 = vsel %vm1043_vm13, %v1040_v8, 0.0  ;;  %v1199_v47 = vsel %vm1043_vm13, %v1279_v11, 0.0 }
 0x1de   :  { %vm965_vm1 = vweird.f32 %v861_v44  ;;  %v837_v52 = vadd.f32 %v812_v21, %v787_v50  ;;  %v1088_v60 = vadd.f32 %v1087_v12, %v1086_v32  ;;  %v1200_v15 = vadd.f32 %v1199_v47, %v1198_v57 }
 0x1df   :  { %vm990_vm2 = vmxor %vm965_vm1, %vm1442_vm11 }
 0x1e0   :  { %v1041_v46 = vsel %vm990_vm2, %v861_v44, 0.0  ;;  %v1280_v55 = vsel %vm990_vm2, 1.0, %v1443_v22  ;;  %v862_v7 = vsub.f32 0.0, %v837_v52 }
 0x1e1   :  { %v1089_v49 = vsel %vm1043_vm13, %v1041_v46, 0.0  ;;  %v1201_v31 = vsel %vm1043_vm13, %v1280_v55, 0.0 }
 0x1e2   :  { %vm966_vm3 = vweird.f32 %v862_v7  ;;  %v1090_v24 = vadd.f32 %v1089_v49, %v1088_v60  ;;  %v1202_v0 = vadd.f32 %v1201_v31, %v1200_v15 }
 0x1e3   :  { %vm991_vm4 = vmxor %vm966_vm3, %vm1442_vm11 }
 0x1e4   :  { %v1042_v23 = vsel %vm991_vm4, %v862_v7, 0.0  ;;  %v1281_v26 = vsel %vm991_vm4, 1.0, %v1443_v22 }
 0x1e5   :  { %v1091_v38 = vsel %vm1043_vm13, %v1042_v23, 0.0  ;;  %v1203_v37 = vsel %vm1043_vm13, %v1281_v26, 0.0 }
 0x1e6   :  { %v1092_v43 = vadd.f32 %v1091_v38, %v1090_v24  ;;  %v1204_v39 = vadd.f32 %v1203_v37, %v1202_v0 }
 0x1e8   :  { %1093 = vadd.xlane.f32.xlu1 %v1092_v43  ;;  %1205 = vadd.xlane.f32.xlu0 %v1204_v39 }
 0x275   :  { %v1094_v18 = vpop.xlane.xlu1 %1093  ;;  %v1206_v28 = vpop.xlane.xlu0 %1205 }
 0x276   :  { %v1095_v5 = vrot.slane %v1094_v18, 4  ;;  %v1207_v10 = vrot.slane %v1206_v28, 4 }
 0x278   :  { %v1096_v48 = vadd.f32 %v1095_v5, %v1094_v18  ;;  %v1208_v56 = vadd.f32 %v1207_v10, %v1206_v28 }
 0x27a   :  { %v1097_v59 = vrot.slane %v1096_v48, 2  ;;  %v1209_v17 = vrot.slane %v1208_v56, 2 }
 0x27c   :  { %v1210_v29 = vadd.f32 %v1209_v17, %v1208_v56  ;;  %v1098_v34 = vadd.f32 %v1097_v59, %v1096_v48 }
 0x27e   :  { %v1099_v22 = vrot.slane %v1098_v34, 1  ;;  %v1211_v54 = vrot.slane %v1210_v29, 1 }
 0x280   :  { %v1100_v53 = vadd.f32 %v1099_v22, %v1098_v34  ;;  %v1212_v16 = vadd.f32 %v1211_v54, %v1210_v29 }
 0x282   :  { %1282 = vpush %v1100_v53 }
 0x283   :  { %1284 = vpush %v1212_v16 }
 0x2b3   :  { %s1283_s30 = spop %1282 }
 0x2b4   :  { %v1102_v61 = vstv %s1283_s30  ;;  %s1285_s6 = spop %1284 }
 0x2b5   :  { %v1214_v51 = vstv %s1285_s6  ;;  %1104 = vst [vmem:[#allocation2] sm:$0xff] %v1102_v61 }
 0x2b6   :  { %1216 = vst [vmem:[#allocation4] sm:$0xff] %v1214_v51 }
 0x2b7   :  { %1404 = shalt.err (!%p1401_p4)
}
 0x2b8   :  { %s1405_s10 = scalar_lea.hbm %s2280_s2, 128 }
 0x2b9   :  { %p1406_p5 = scmp.ne.s32.totalorder %s2280_s2, %s1405_s10  ;;  %p1409_p6 = scmp.lt.u32.totalorder %s1405_s10, %s2280_s2 }
 0x2bb   :  { %p1411_p7 = pnand %p1409_p6, %p1406_p5 }
 0x2bd   :  { %1414 = shalt.err (!%p1411_p7)
}
 0x2be   :  { %1226 = dma.vmem_to_hbm [thread:$0]  %s1224_s29, 128, %s2280_s2, [#allocation3]  }
 0x2bf   :  { %s1415_s16 = scalar_lea.vmem %s1234_s5, 128  ;;  %p1420_p9 = scmp.lt.s32.totalorder %s1234_s5, %s1234_s5 }
 0x2c0   :  { %p1416_p8 = scmp.ne.s32.totalorder %s1234_s5, %s1415_s16  ;;  %p1421_p10 = scmp.lt.s32.totalorder %s1415_s16, %s1415_s16 }
 0x2c2   :  { %p1422_p11 = por %p1421_p10, %p1420_p9 }
 0x2c4   :  { %p1423_p12 = pnand %p1422_p11, %p1416_p8 }
 0x2c6   :  { %1426 = shalt.err (!%p1423_p12)
}
 0x2c7   :  { %s1427_s19 = scalar_lea.hbm %s2281_s3, 128 }
 0x2c8   :  { %p1428_p13 = scmp.ne.s32.totalorder %s2281_s3, %s1427_s19  ;;  %p1431_p0 = scmp.lt.u32.totalorder %s1427_s19, %s2281_s3 }
 0x2ca   :  { %p1433_p1 = pnand %p1431_p0, %p1428_p13 }
 0x2cc   :  { %1436 = shalt.err (!%p1433_p1)
}
 0x2cd   :  { %1236 = dma.vmem_to_hbm [thread:$0]  %s1234_s5, 128, %s2281_s3, [#allocation5]  }
 0x2ce   :  { %1437 = dma.done.wait [#allocation3], 128  }
 0x2cf   :  { %1438 = vsyncadd [#allocation3], 4294967168 }
 0x2d0   :  { %1439 = dma.done.wait [#allocation5], 128  }
 0x2d1   :  { %1440 = vsyncadd [#allocation5], 4294967168 }
 0x2d2   :  { %1243 = vsyncpa [#allocation3], 1 }
 0x2d3   :  { %1244 = vsyncpa [#allocation5], 1 }

</bundles_post_ra>
